<compile_context>
chip_gen: v6e
topology: v6e:2x2x1
jax: 0.10.0
libtpu: 0.0.40
codegen_flags: <defaults>
</compile_context>

<pallas_src>
import functools
import math

import jax
import jax.numpy as jnp
from jax.experimental import pallas as pl
from jax.experimental.pallas import tpu as pltpu


# ----------------------------------------------------------------------------
# Fused SGCN forward kernel
# ----------------------------------------------------------------------------

def _sgcn_fused_kernel(a_ref, x_ref, wb_agg_ref, wb_self_ref, bb_ref,
                       wd_ref, bd_ref, m128_ref, m256_ref,
                       sel_ref, regw_ref, tgt_ref,
                       z_ref, loss_ref, *, l1_lambda, lamb):
    f32 = jnp.float32
    x = x_ref[...]                                               # (N, F)

    # ---- base layer: 4 signed/directed heads fused into one (N, 4*L0) block.
    #      column block k = (A_k @ X) @ W1_k + X @ W2_k + b_k
    h_pre = jnp.dot(x, wb_self_ref[...], preferred_element_type=f32) + bb_ref[...]
    for k in range(4):                                           # unrolled
        agg = jnp.dot(a_ref[k], x, preferred_element_type=f32)   # (N, F)
        h_pre = h_pre + jnp.dot(agg, wb_agg_ref[k], preferred_element_type=f32)
    # per-head L2 normalize via block-diag mask matmul (stays lane-dense)
    ssq = jnp.dot(h_pre * h_pre, m128_ref[...], preferred_element_type=f32)
    h_all = jnp.tanh(h_pre * jax.lax.rsqrt(jnp.maximum(ssq, 1e-24)))  # (N, 4*L0)

    # ---- deep layer: each deep adjacency multiplied ONCE against the full
    #      (N, 4*L0) embedding stack; all 8 heads emitted as one (N, 8*L1) block.
    d_pre = jnp.dot(h_all, wd_ref[4], preferred_element_type=f32) + bd_ref[...]
    for k in range(4):                                           # unrolled
        agg = jnp.dot(a_ref[4 + k], h_all, preferred_element_type=f32)  # (N, 4*L0)
        d_pre = d_pre + jnp.dot(agg, wd_ref[k], preferred_element_type=f32)
    ssq_d = jnp.dot(d_pre * d_pre, m256_ref[...], preferred_element_type=f32)
    z = jnp.tanh(d_pre * jax.lax.rsqrt(jnp.maximum(ssq_d, 1e-24)))    # (N, 8*L1)
    z_ref[...] = z

    # ---- regression head + loss (args.class_weights = False)
    train_z = jnp.dot(sel_ref[...], z, preferred_element_type=f32)    # (M, 8*L1)
    logits = jnp.sum(train_z * regw_ref[...], axis=-1, keepdims=True)  # VPU/XLU GEMV
    t = tgt_ref[...]
    # BCE from logits: log(sigmoid(x)) = min(x,0)-log1p(exp(-|x|)); clamp -100
    log1pexp = jnp.log1p(jnp.exp(-jnp.abs(logits)))
    logp = jnp.maximum(jnp.minimum(logits, 0.0) - log1pexp, -100.0)
    log1mp = jnp.maximum(jnp.minimum(-logits, 0.0) - log1pexp, -100.0)
    bce = -jnp.mean(t * logp + (1.0 - t) * log1mp)
    l1 = jnp.sum(jnp.abs(regw_ref[...])) / regw_ref.shape[1]
    loss_ref[...] = jnp.reshape(bce + lamb * 0.0 + l1_lambda * l1, (1, 1))


def _full_spec(shape):
    return pl.BlockSpec(shape, lambda i: (0,) * len(shape))


# ----------------------------------------------------------------------------
# Graph glue: dense row-normalized adjacencies (== scatter_mean over edges).
# Only ONE scatter build per edge sign; directional / self-loop variants are
# derived (transpose / + eye / renormalize).
# ----------------------------------------------------------------------------

def build_adjacencies(edges, n):
    src, dst = edges[0], edges[1]
    keep = (src != dst).astype(jnp.float32)                  # remove self loops
    raw = jnp.zeros((n, n), jnp.float32).at[src, dst].add(keep)
    eye = jnp.eye(n, dtype=jnp.float32)

    def norm(a):
        deg = jnp.sum(a, axis=1, keepdims=True)
        return a / jnp.maximum(deg, 1.0)                     # mean over edge list

    return norm(raw), norm(raw.T), norm(raw + eye), norm(raw.T + eye)
    # (out, in, out+self, in+self)


# ----------------------------------------------------------------------------
# Weight assembly (block-structured weights for the fused lane-dense matmuls)
# ----------------------------------------------------------------------------

_BASE_ORDER = ["pos_base_out", "neg_base_out", "pos_base_in", "neg_base_in"]

# (head name, a1, b1, a2, b2, own1, own2) -- a* index the deep adjacency stack
# [p_out_s, n_out_s, p_in_s, n_in_s]; b*/own* index the base embedding blocks
# [h_pos_out, h_neg_out, h_pos_in, h_neg_in].
_DEEP_LAYOUT = [
    ("outoutF", 0, 0, 1, 1, 0, 1),
    ("outinF",  0, 2, 3, 3, 2, 3),
    ("inoutF",  2, 0, 1, 1, 0, 1),
    ("ininF",   2, 2, 3, 3, 2, 3),
    ("outoutE", 0, 1, 1, 0, 1, 0),
    ("outinE",  0, 3, 3, 2, 3, 2),
    ("inoutE",  2, 1, 1, 0, 1, 0),
    ("ininE",   2, 3, 3, 2, 3, 2),
]


def _assemble_base_weights(params, F, L0):
    w_agg = jnp.zeros((4, F, 4 * L0), jnp.float32)
    w_self = jnp.zeros((F, 4 * L0), jnp.float32)
    b_all = jnp.zeros((1, 4 * L0), jnp.float32)
    for k, name in enumerate(_BASE_ORDER):
        W, b = params[name]                    # (2F, L0), (L0,)
        c = slice(k * L0, (k + 1) * L0)
        w_agg = w_agg.at[k, :, c].set(W[:F])   # aggregated-neighbour part
        w_self = w_self.at[:, c].set(W[F:])    # own-features part
        b_all = b_all.at[0, c].set(b)
    return w_agg, w_self, b_all


def _assemble_deep_weights(params, L0, L1):
    wd = jnp.zeros((5, 4 * L0, 8 * L1), jnp.float32)   # [4 agg stacks, own]
    bd = jnp.zeros((1, 8 * L1), jnp.float32)
    for h, (name, a1, b1, a2, b2, o1, o2) in enumerate(_DEEP_LAYOUT):
        W, b = params[name]                    # (4*L0, L1), (L1,)
        c = slice(h * L1, (h + 1) * L1)
        wd = wd.at[a1, b1 * L0:(b1 + 1) * L0, c].set(W[0 * L0:1 * L0])
        wd = wd.at[a2, b2 * L0:(b2 + 1) * L0, c].set(W[1 * L0:2 * L0])
        wd = wd.at[4, o1 * L0:(o1 + 1) * L0, c].set(W[2 * L0:3 * L0])
        wd = wd.at[4, o2 * L0:(o2 + 1) * L0, c].set(W[3 * L0:4 * L0])
        bd = bd.at[0, c].set(b)
    return wd, bd


def _block_mask(width, block):
    g = jnp.arange(width, dtype=jnp.int32) // block
    return (g[:, None] == g[None, :]).astype(jnp.float32)


# ----------------------------------------------------------------------------
# Parameter init (deterministic, shapes per the module's __init__)
# ----------------------------------------------------------------------------

def init_params(key, F, layers):
    L0, L1 = layers[0], layers[1]

    def lin(k, din, dout):
        bound = 1.0 / math.sqrt(din)
        kw, kb = jax.random.split(k)
        W = jax.random.uniform(kw, (din, dout), jnp.float32, -bound, bound)
        b = jax.random.uniform(kb, (dout,), jnp.float32, -bound, bound)
        return W, b

    keys = jax.random.split(key, 13)
    params = {name: lin(keys[i], 2 * F, L0) for i, name in enumerate(_BASE_ORDER)}
    for i, (name, *_rest) in enumerate(_DEEP_LAYOUT):
        params[name] = lin(keys[4 + i], 4 * L0, L1)
    std = math.sqrt(2.0 / (8 * L1 + 1))        # xavier_normal_((8*L1, 1))
    params["regression_weights"] = std * jax.random.normal(
        keys[12], (8 * L1, 1), jnp.float32)
    return params


# ----------------------------------------------------------------------------
# Forward pass (matches SignedGraphConvolutionalNetwork.forward)
# ----------------------------------------------------------------------------

@functools.partial(jax.jit, static_argnames=("lamb", "l1_lambda"))
def sgcn_forward(params, X, positive_edges, negative_edges, target,
                 train_indice, indice_map, lamb, l1_lambda):
    N, F = X.shape
    L0 = params["pos_base_out"][0].shape[1]
    L1 = params["outoutF"][0].shape[1]

    p_out, p_in, p_out_s, p_in_s = build_adjacencies(positive_edges, N)
    n_out, n_in, n_out_s, n_in_s = build_adjacencies(negative_edges, N)
    a_stack = jnp.stack([p_out, n_out, p_in, n_in,
                         p_out_s, n_out_s, p_in_s, n_in_s])          # (8, N, N)

    wb_agg, wb_self, bb = _assemble_base_weights(params, F, L0)
    wd, bd = _assemble_deep_weights(params, L0, L1)
    m128 = _block_mask(4 * L0, L0)
    m256 = _block_mask(8 * L1, L1)

    train_z_indice = indice_map[train_indice]
    sel = jax.nn.one_hot(train_z_indice, N, dtype=jnp.float32)       # (M, N)
    regw_row = params["regression_weights"].reshape(1, 8 * L1)
    tgt = target[train_indice].astype(jnp.float32).reshape(-1, 1)    # (M, 1)
    M = sel.shape[0]

    kernel = functools.partial(_sgcn_fused_kernel,
                               l1_lambda=float(l1_lambda), lamb=float(lamb))
    z, loss = pl.pallas_call(
        kernel,
        out_shape=(jax.ShapeDtypeStruct((N, 8 * L1), jnp.float32),
                   jax.ShapeDtypeStruct((1, 1), jnp.float32)),
        grid=(1,),
        in_specs=[_full_spec((8, N, N)),
                  _full_spec((N, F)),
                  _full_spec((4, F, 4 * L0)),
                  _full_spec((F, 4 * L0)),
                  _full_spec((1, 4 * L0)),
                  _full_spec((5, 4 * L0, 8 * L1)),
                  _full_spec((1, 8 * L1)),
                  _full_spec((4 * L0, 4 * L0)),
                  _full_spec((8 * L1, 8 * L1)),
                  _full_spec((M, N)),
                  _full_spec((1, 8 * L1)),
                  _full_spec((M, 1))],
        out_specs=(_full_spec((N, 8 * L1)), _full_spec((1, 1))),
        compiler_params=pltpu.CompilerParams(dimension_semantics=("arbitrary",)),
    )(a_stack, X, wb_agg, wb_self, bb, wd, bd, m128, m256, sel, regw_row, tgt)
    return loss[0, 0], z


# ----------------------------------------------------------------------------
# Pure-JAX reference (per-head formulation) for a correctness cross-check
# ----------------------------------------------------------------------------

def sgcn_reference(params, X, positive_edges, negative_edges, target,
                   train_indice, indice_map, lamb, l1_lambda):
    hi = jax.lax.Precision.HIGHEST
    N = X.shape[0]
    p_out, p_in, p_out_s, p_in_s = build_adjacencies(positive_edges, N)
    n_out, n_in, n_out_s, n_in_s = build_adjacencies(negative_edges, N)

    def l2n(h):
        nrm = jnp.sqrt(jnp.sum(h * h, axis=-1, keepdims=True))
        return h / jnp.maximum(nrm, 1e-12)

    def base(A, W, b):
        g = jnp.concatenate([jnp.dot(A, X, precision=hi), X], axis=1)
        return jnp.tanh(l2n(jnp.dot(g, W, precision=hi) + b))

    def deep(A1, A2, x1, x2, W, b):
        g = jnp.concatenate([jnp.dot(A1, x1, precision=hi),
                             jnp.dot(A2, x2, precision=hi), x1, x2], axis=1)
        return jnp.tanh(l2n(jnp.dot(g, W, precision=hi) + b))

    h_po = base(p_out, *params["pos_base_out"])
    h_no = base(n_out, *params["neg_base_out"])
    h_pi = base(p_in, *params["pos_base_in"])
    h_ni = base(n_in, *params["neg_base_in"])

    z = jnp.concatenate([
        deep(p_out_s, n_out_s, h_po, h_no, *params["outoutF"]),
        deep(p_out_s, n_in_s, h_pi, h_ni, *params["outinF"]),
        deep(p_in_s, n_out_s, h_po, h_no, *params["inoutF"]),
        deep(p_in_s, n_in_s, h_pi, h_ni, *params["ininF"]),
        deep(p_out_s, n_out_s, h_no, h_po, *params["outoutE"]),
        deep(p_out_s, n_in_s, h_ni, h_pi, *params["outinE"]),
        deep(p_in_s, n_out_s, h_no, h_po, *params["inoutE"]),
        deep(p_in_s, n_in_s, h_ni, h_pi, *params["ininE"]),
    ], axis=1)

    train_z = z[indice_map[train_indice]]
    p = jax.nn.sigmoid(jnp.dot(train_z, params["regression_weights"], precision=hi))
    t = target[train_indice].astype(jnp.float32).reshape(-1, 1)
    logp = jnp.maximum(jnp.log(p), -100.0)
    log1mp = jnp.maximum(jnp.log(1.0 - p), -100.0)
    bce = -jnp.mean(t * logp + (1.0 - t) * log1mp)
    l1 = (jnp.sum(jnp.abs(params["regression_weights"]))
          / params["regression_weights"].shape[0])
    return bce + lamb * 0.0 + l1_lambda * l1, z


# ----------------------------------------------------------------------------
# Main
# ----------------------------------------------------------------------------

if __name__ == "__main__":
    key = jax.random.PRNGKey(0)
    N, F, E = 32, 16, 64          # nodes, node-feature dim, edges per sign
    layers = [32, 32]             # args.layers
    lamb, l1_lambda = 1.0, 0.01   # args.lamb, args.l1_lambda
    M = 16                        # number of training indices

    k_par, k_x, k_pe, k_ne, k_t, k_tr = jax.random.split(key, 6)
    params = init_params(k_par, F, layers)
    X = jax.random.normal(k_x, (N, F), jnp.float32)
    positive_edges = jax.random.randint(k_pe, (2, E), 0, N, jnp.int32)
    negative_edges = jax.random.randint(k_ne, (2, E), 0, N, jnp.int32)
    target = jax.random.randint(k_t, (N,), 0, 2, jnp.int32)
    train_indice = jax.random.permutation(k_tr, N)[:M]
    indice_map = jnp.arange(N, dtype=jnp.int32)   # nodes_dict['indice']

    loss, z = sgcn_forward(params, X, positive_edges, negative_edges, target,
                           train_indice, indice_map, lamb, l1_lambda)
    jax.block_until_ready((loss, z))

    loss_ref, z_ref = sgcn_reference(params, X, positive_edges, negative_edges,
                                     target, train_indice, indice_map,
                                     lamb, l1_lambda)
    assert z.shape == (N, 8 * layers[-1])
    assert jnp.isfinite(loss)
    assert jnp.allclose(z, z_ref, atol=2e-2), float(jnp.max(jnp.abs(z - z_ref)))
    assert jnp.allclose(loss, loss_ref, atol=2e-2)
    print("KERNEL_OK")
</pallas_src>

<mosaic_0001>
module attributes {stable_mosaic.version = 11 : i64} {
  func.func private @main(%arg0: i32) attributes {dimension_semantics = [#tpu.dimension_semantics<core_parallel>], iteration_bounds = array<i64: 2>, tpu.core_type = #tpu.core_type<sc_scalar_subcore>, window_params = []} {
    return
  }
}

module attributes {stable_mosaic.version = 11 : i64} {
  func.func private @main(%arg0: i32) attributes {dimension_semantics = [#tpu.dimension_semantics<core_parallel>], iteration_bounds = array<i64: 2>, tpu.core_type = #tpu.core_type<sc_scalar_subcore>, window_params = []} {
    return
  }
}

module attributes {stable_mosaic.version = 11 : i64} {
  func.func @_sgcn_fused_kernel(%arg0: i32, %arg1: memref<8x32x32xf32, #tpu.memory_space<vmem>>, %arg2: memref<32x16xf32, #tpu.memory_space<vmem>>, %arg3: memref<4x16x128xf32, #tpu.memory_space<vmem>>, %arg4: memref<16x128xf32, #tpu.memory_space<vmem>>, %arg5: memref<1x128xf32, #tpu.memory_space<vmem>>, %arg6: memref<5x128x256xf32, #tpu.memory_space<vmem>>, %arg7: memref<1x256xf32, #tpu.memory_space<vmem>>, %arg8: memref<128x128xf32, #tpu.memory_space<vmem>>, %arg9: memref<256x256xf32, #tpu.memory_space<vmem>>, %arg10: memref<16x32xf32, #tpu.memory_space<vmem>>, %arg11: memref<1x256xf32, #tpu.memory_space<vmem>>, %arg12: memref<16x1xf32, #tpu.memory_space<vmem>>, %arg13: memref<32x256xf32, #tpu.memory_space<vmem>>, %arg14: memref<1x1xf32, #tpu.memory_space<vmem>>) attributes {dimension_semantics = [#tpu.dimension_semantics<arbitrary>], iteration_bounds = array<i64: 1>, scalar_prefetch = 0 : i64, scratch_operands = 0 : i64, tpu.core_type = #tpu.core_type<tc>, window_params = [{pipeline_mode = #tpu.pipeline_mode<synchronous>, transform_indices = @transform_0, window_bounds = array<i64: 8, 32, 32>}, {pipeline_mode = #tpu.pipeline_mode<synchronous>, transform_indices = @transform_1, window_bounds = array<i64: 32, 16>}, {pipeline_mode = #tpu.pipeline_mode<synchronous>, transform_indices = @transform_2, window_bounds = array<i64: 4, 16, 128>}, {pipeline_mode = #tpu.pipeline_mode<synchronous>, transform_indices = @transform_3, window_bounds = array<i64: 16, 128>}, {pipeline_mode = #tpu.pipeline_mode<synchronous>, transform_indices = @transform_4, window_bounds = array<i64: 1, 128>}, {pipeline_mode = #tpu.pipeline_mode<synchronous>, transform_indices = @transform_5, window_bounds = array<i64: 5, 128, 256>}, {pipeline_mode = #tpu.pipeline_mode<synchronous>, transform_indices = @transform_6, window_bounds = array<i64: 1, 256>}, {pipeline_mode = #tpu.pipeline_mode<synchronous>, transform_indices = @transform_7, window_bounds = array<i64: 128, 128>}, {pipeline_mode = #tpu.pipeline_mode<synchronous>, transform_indices = @transform_8, window_bounds = array<i64: 256, 256>}, {pipeline_mode = #tpu.pipeline_mode<synchronous>, transform_indices = @transform_9, window_bounds = array<i64: 16, 32>}, {pipeline_mode = #tpu.pipeline_mode<synchronous>, transform_indices = @transform_10, window_bounds = array<i64: 1, 256>}, {pipeline_mode = #tpu.pipeline_mode<synchronous>, transform_indices = @transform_11, window_bounds = array<i64: 16, 1>}, {pipeline_mode = #tpu.pipeline_mode<synchronous>, transform_indices = @transform_12, window_bounds = array<i64: 32, 256>}, {pipeline_mode = #tpu.pipeline_mode<synchronous>, transform_indices = @transform_13, window_bounds = array<i64: 1, 1>}]} {
    %c0 = arith.constant 0 : index
    %c0_0 = arith.constant 0 : index
    %0 = vector.load %arg2[%c0, %c0_0] : memref<32x16xf32, #tpu.memory_space<vmem>>, vector<32x16xf32>
    %c0_1 = arith.constant 0 : index
    %c0_2 = arith.constant 0 : index
    %1 = vector.load %arg4[%c0_1, %c0_2] : memref<16x128xf32, #tpu.memory_space<vmem>>, vector<16x128xf32>
    %cst = arith.constant dense<0.000000e+00> : vector<32x128xf32>
    %2 = tpu.matmul %0, %1, %cst {dimension_numbers = #tpu.dot_dimension_numbers<[1], [0], [0], [1], [0, 0, 1, 1], [], []>} : vector<32x16xf32>, vector<16x128xf32>, vector<32x128xf32> -> vector<32x128xf32>
    %c0_3 = arith.constant 0 : index
    %c0_4 = arith.constant 0 : index
    %3 = vector.load %arg5[%c0_3, %c0_4] : memref<1x128xf32, #tpu.memory_space<vmem>>, vector<1x128xf32>
    %4 = vector.broadcast %3 : vector<1x128xf32> to vector<32x128xf32>
    %5 = arith.addf %2, %4 : vector<32x128xf32>
    %c0_5 = arith.constant 0 : index
    %c0_6 = arith.constant 0 : index
    %c0_7 = arith.constant 0 : index
    %6 = vector.load %arg1[%c0_5, %c0_6, %c0_7] : memref<8x32x32xf32, #tpu.memory_space<vmem>>, vector<1x32x32xf32>
    %7 = vector.shape_cast %6 : vector<1x32x32xf32> to vector<32x32xf32>
    %cst_8 = arith.constant dense<0.000000e+00> : vector<32x16xf32>
    %8 = tpu.matmul %7, %0, %cst_8 {dimension_numbers = #tpu.dot_dimension_numbers<[1], [0], [0], [1], [0, 0, 1, 1], [], []>} : vector<32x32xf32>, vector<32x16xf32>, vector<32x16xf32> -> vector<32x16xf32>
    %c0_9 = arith.constant 0 : index
    %c0_10 = arith.constant 0 : index
    %c0_11 = arith.constant 0 : index
    %9 = vector.load %arg3[%c0_9, %c0_10, %c0_11] : memref<4x16x128xf32, #tpu.memory_space<vmem>>, vector<1x16x128xf32>
    %10 = vector.shape_cast %9 : vector<1x16x128xf32> to vector<16x128xf32>
    %cst_12 = arith.constant dense<0.000000e+00> : vector<32x128xf32>
    %11 = tpu.matmul %8, %10, %cst_12 {dimension_numbers = #tpu.dot_dimension_numbers<[1], [0], [0], [1], [0, 0, 1, 1], [], []>} : vector<32x16xf32>, vector<16x128xf32>, vector<32x128xf32> -> vector<32x128xf32>
    %12 = arith.addf %5, %11 : vector<32x128xf32>
    %c1 = arith.constant 1 : index
    %c0_13 = arith.constant 0 : index
    %c0_14 = arith.constant 0 : index
    %13 = vector.load %arg1[%c1, %c0_13, %c0_14] : memref<8x32x32xf32, #tpu.memory_space<vmem>>, vector<1x32x32xf32>
    %14 = vector.shape_cast %13 : vector<1x32x32xf32> to vector<32x32xf32>
    %cst_15 = arith.constant dense<0.000000e+00> : vector<32x16xf32>
    %15 = tpu.matmul %14, %0, %cst_15 {dimension_numbers = #tpu.dot_dimension_numbers<[1], [0], [0], [1], [0, 0, 1, 1], [], []>} : vector<32x32xf32>, vector<32x16xf32>, vector<32x16xf32> -> vector<32x16xf32>
    %c1_16 = arith.constant 1 : index
    %c0_17 = arith.constant 0 : index
    %c0_18 = arith.constant 0 : index
    %16 = vector.load %arg3[%c1_16, %c0_17, %c0_18] : memref<4x16x128xf32, #tpu.memory_space<vmem>>, vector<1x16x128xf32>
    %17 = vector.shape_cast %16 : vector<1x16x128xf32> to vector<16x128xf32>
    %cst_19 = arith.constant dense<0.000000e+00> : vector<32x128xf32>
    %18 = tpu.matmul %15, %17, %cst_19 {dimension_numbers = #tpu.dot_dimension_numbers<[1], [0], [0], [1], [0, 0, 1, 1], [], []>} : vector<32x16xf32>, vector<16x128xf32>, vector<32x128xf32> -> vector<32x128xf32>
    %19 = arith.addf %12, %18 : vector<32x128xf32>
    %c2 = arith.constant 2 : index
    %c0_20 = arith.constant 0 : index
    %c0_21 = arith.constant 0 : index
    %20 = vector.load %arg1[%c2, %c0_20, %c0_21] : memref<8x32x32xf32, #tpu.memory_space<vmem>>, vector<1x32x32xf32>
    %21 = vector.shape_cast %20 : vector<1x32x32xf32> to vector<32x32xf32>
    %cst_22 = arith.constant dense<0.000000e+00> : vector<32x16xf32>
    %22 = tpu.matmul %21, %0, %cst_22 {dimension_numbers = #tpu.dot_dimension_numbers<[1], [0], [0], [1], [0, 0, 1, 1], [], []>} : vector<32x32xf32>, vector<32x16xf32>, vector<32x16xf32> -> vector<32x16xf32>
    %c2_23 = arith.constant 2 : index
    %c0_24 = arith.constant 0 : index
    %c0_25 = arith.constant 0 : index
    %23 = vector.load %arg3[%c2_23, %c0_24, %c0_25] : memref<4x16x128xf32, #tpu.memory_space<vmem>>, vector<1x16x128xf32>
    %24 = vector.shape_cast %23 : vector<1x16x128xf32> to vector<16x128xf32>
    %cst_26 = arith.constant dense<0.000000e+00> : vector<32x128xf32>
    %25 = tpu.matmul %22, %24, %cst_26 {dimension_numbers = #tpu.dot_dimension_numbers<[1], [0], [0], [1], [0, 0, 1, 1], [], []>} : vector<32x16xf32>, vector<16x128xf32>, vector<32x128xf32> -> vector<32x128xf32>
    %26 = arith.addf %19, %25 : vector<32x128xf32>
    %c3 = arith.constant 3 : index
    %c0_27 = arith.constant 0 : index
    %c0_28 = arith.constant 0 : index
    %27 = vector.load %arg1[%c3, %c0_27, %c0_28] : memref<8x32x32xf32, #tpu.memory_space<vmem>>, vector<1x32x32xf32>
    %28 = vector.shape_cast %27 : vector<1x32x32xf32> to vector<32x32xf32>
    %cst_29 = arith.constant dense<0.000000e+00> : vector<32x16xf32>
    %29 = tpu.matmul %28, %0, %cst_29 {dimension_numbers = #tpu.dot_dimension_numbers<[1], [0], [0], [1], [0, 0, 1, 1], [], []>} : vector<32x32xf32>, vector<32x16xf32>, vector<32x16xf32> -> vector<32x16xf32>
    %c3_30 = arith.constant 3 : index
    %c0_31 = arith.constant 0 : index
    %c0_32 = arith.constant 0 : index
    %30 = vector.load %arg3[%c3_30, %c0_31, %c0_32] : memref<4x16x128xf32, #tpu.memory_space<vmem>>, vector<1x16x128xf32>
    %31 = vector.shape_cast %30 : vector<1x16x128xf32> to vector<16x128xf32>
    %cst_33 = arith.constant dense<0.000000e+00> : vector<32x128xf32>
    %32 = tpu.matmul %29, %31, %cst_33 {dimension_numbers = #tpu.dot_dimension_numbers<[1], [0], [0], [1], [0, 0, 1, 1], [], []>} : vector<32x16xf32>, vector<16x128xf32>, vector<32x128xf32> -> vector<32x128xf32>
    %33 = arith.addf %26, %32 : vector<32x128xf32>
    %34 = arith.mulf %33, %33 : vector<32x128xf32>
    %c0_34 = arith.constant 0 : index
    %c0_35 = arith.constant 0 : index
    %35 = vector.load %arg8[%c0_34, %c0_35] : memref<128x128xf32, #tpu.memory_space<vmem>>, vector<128x128xf32>
    %cst_36 = arith.constant dense<0.000000e+00> : vector<32x128xf32>
    %36 = tpu.matmul %34, %35, %cst_36 {dimension_numbers = #tpu.dot_dimension_numbers<[1], [0], [0], [1], [0, 0, 1, 1], [], []>} : vector<32x128xf32>, vector<128x128xf32>, vector<32x128xf32> -> vector<32x128xf32>
    %cst_37 = arith.constant 1.000000e-24 : f32
    %37 = vector.broadcast %cst_37 : f32 to vector<32x128xf32>
    %38 = arith.maximumf %36, %37 : vector<32x128xf32>
    %39 = math.rsqrt %38 : vector<32x128xf32>
    %40 = arith.mulf %33, %39 : vector<32x128xf32>
    %41 = math.tanh %40 : vector<32x128xf32>
    %c4 = arith.constant 4 : index
    %c0_38 = arith.constant 0 : index
    %c0_39 = arith.constant 0 : index
    %42 = vector.load %arg6[%c4, %c0_38, %c0_39] : memref<5x128x256xf32, #tpu.memory_space<vmem>>, vector<1x128x256xf32>
    %43 = vector.shape_cast %42 : vector<1x128x256xf32> to vector<128x256xf32>
    %cst_40 = arith.constant dense<0.000000e+00> : vector<32x256xf32>
    %44 = tpu.matmul %41, %43, %cst_40 {dimension_numbers = #tpu.dot_dimension_numbers<[1], [0], [0], [1], [0, 0, 1, 1], [], []>} : vector<32x128xf32>, vector<128x256xf32>, vector<32x256xf32> -> vector<32x256xf32>
    %c0_41 = arith.constant 0 : index
    %c0_42 = arith.constant 0 : index
    %45 = vector.load %arg7[%c0_41, %c0_42] : memref<1x256xf32, #tpu.memory_space<vmem>>, vector<1x256xf32>
    %46 = vector.broadcast %45 : vector<1x256xf32> to vector<32x256xf32>
    %47 = arith.addf %44, %46 : vector<32x256xf32>
    %c4_43 = arith.constant 4 : index
    %c0_44 = arith.constant 0 : index
    %c0_45 = arith.constant 0 : index
    %48 = vector.load %arg1[%c4_43, %c0_44, %c0_45] : memref<8x32x32xf32, #tpu.memory_space<vmem>>, vector<1x32x32xf32>
    %49 = vector.shape_cast %48 : vector<1x32x32xf32> to vector<32x32xf32>
    %cst_46 = arith.constant dense<0.000000e+00> : vector<32x128xf32>
    %50 = tpu.matmul %49, %41, %cst_46 {dimension_numbers = #tpu.dot_dimension_numbers<[1], [0], [0], [1], [0, 0, 1, 1], [], []>} : vector<32x32xf32>, vector<32x128xf32>, vector<32x128xf32> -> vector<32x128xf32>
    %c0_47 = arith.constant 0 : index
    %c0_48 = arith.constant 0 : index
    %c0_49 = arith.constant 0 : index
    %51 = vector.load %arg6[%c0_47, %c0_48, %c0_49] : memref<5x128x256xf32, #tpu.memory_space<vmem>>, vector<1x128x256xf32>
    %52 = vector.shape_cast %51 : vector<1x128x256xf32> to vector<128x256xf32>
    %cst_50 = arith.constant dense<0.000000e+00> : vector<32x256xf32>
    %53 = tpu.matmul %50, %52, %cst_50 {dimension_numbers = #tpu.dot_dimension_numbers<[1], [0], [0], [1], [0, 0, 1, 1], [], []>} : vector<32x128xf32>, vector<128x256xf32>, vector<32x256xf32> -> vector<32x256xf32>
    %54 = arith.addf %47, %53 : vector<32x256xf32>
    %c5 = arith.constant 5 : index
    %c0_51 = arith.constant 0 : index
    %c0_52 = arith.constant 0 : index
    %55 = vector.load %arg1[%c5, %c0_51, %c0_52] : memref<8x32x32xf32, #tpu.memory_space<vmem>>, vector<1x32x32xf32>
    %56 = vector.shape_cast %55 : vector<1x32x32xf32> to vector<32x32xf32>
    %cst_53 = arith.constant dense<0.000000e+00> : vector<32x128xf32>
    %57 = tpu.matmul %56, %41, %cst_53 {dimension_numbers = #tpu.dot_dimension_numbers<[1], [0], [0], [1], [0, 0, 1, 1], [], []>} : vector<32x32xf32>, vector<32x128xf32>, vector<32x128xf32> -> vector<32x128xf32>
    %c1_54 = arith.constant 1 : index
    %c0_55 = arith.constant 0 : index
    %c0_56 = arith.constant 0 : index
    %58 = vector.load %arg6[%c1_54, %c0_55, %c0_56] : memref<5x128x256xf32, #tpu.memory_space<vmem>>, vector<1x128x256xf32>
    %59 = vector.shape_cast %58 : vector<1x128x256xf32> to vector<128x256xf32>
    %cst_57 = arith.constant dense<0.000000e+00> : vector<32x256xf32>
    %60 = tpu.matmul %57, %59, %cst_57 {dimension_numbers = #tpu.dot_dimension_numbers<[1], [0], [0], [1], [0, 0, 1, 1], [], []>} : vector<32x128xf32>, vector<128x256xf32>, vector<32x256xf32> -> vector<32x256xf32>
    %61 = arith.addf %54, %60 : vector<32x256xf32>
    %c6 = arith.constant 6 : index
    %c0_58 = arith.constant 0 : index
    %c0_59 = arith.constant 0 : index
    %62 = vector.load %arg1[%c6, %c0_58, %c0_59] : memref<8x32x32xf32, #tpu.memory_space<vmem>>, vector<1x32x32xf32>
    %63 = vector.shape_cast %62 : vector<1x32x32xf32> to vector<32x32xf32>
    %cst_60 = arith.constant dense<0.000000e+00> : vector<32x128xf32>
    %64 = tpu.matmul %63, %41, %cst_60 {dimension_numbers = #tpu.dot_dimension_numbers<[1], [0], [0], [1], [0, 0, 1, 1], [], []>} : vector<32x32xf32>, vector<32x128xf32>, vector<32x128xf32> -> vector<32x128xf32>
    %c2_61 = arith.constant 2 : index
    %c0_62 = arith.constant 0 : index
    %c0_63 = arith.constant 0 : index
    %65 = vector.load %arg6[%c2_61, %c0_62, %c0_63] : memref<5x128x256xf32, #tpu.memory_space<vmem>>, vector<1x128x256xf32>
    %66 = vector.shape_cast %65 : vector<1x128x256xf32> to vector<128x256xf32>
    %cst_64 = arith.constant dense<0.000000e+00> : vector<32x256xf32>
    %67 = tpu.matmul %64, %66, %cst_64 {dimension_numbers = #tpu.dot_dimension_numbers<[1], [0], [0], [1], [0, 0, 1, 1], [], []>} : vector<32x128xf32>, vector<128x256xf32>, vector<32x256xf32> -> vector<32x256xf32>
    %68 = arith.addf %61, %67 : vector<32x256xf32>
    %c7 = arith.constant 7 : index
    %c0_65 = arith.constant 0 : index
    %c0_66 = arith.constant 0 : index
    %69 = vector.load %arg1[%c7, %c0_65, %c0_66] : memref<8x32x32xf32, #tpu.memory_space<vmem>>, vector<1x32x32xf32>
    %70 = vector.shape_cast %69 : vector<1x32x32xf32> to vector<32x32xf32>
    %cst_67 = arith.constant dense<0.000000e+00> : vector<32x128xf32>
    %71 = tpu.matmul %70, %41, %cst_67 {dimension_numbers = #tpu.dot_dimension_numbers<[1], [0], [0], [1], [0, 0, 1, 1], [], []>} : vector<32x32xf32>, vector<32x128xf32>, vector<32x128xf32> -> vector<32x128xf32>
    %c3_68 = arith.constant 3 : index
    %c0_69 = arith.constant 0 : index
    %c0_70 = arith.constant 0 : index
    %72 = vector.load %arg6[%c3_68, %c0_69, %c0_70] : memref<5x128x256xf32, #tpu.memory_space<vmem>>, vector<1x128x256xf32>
    %73 = vector.shape_cast %72 : vector<1x128x256xf32> to vector<128x256xf32>
    %cst_71 = arith.constant dense<0.000000e+00> : vector<32x256xf32>
    %74 = tpu.matmul %71, %73, %cst_71 {dimension_numbers = #tpu.dot_dimension_numbers<[1], [0], [0], [1], [0, 0, 1, 1], [], []>} : vector<32x128xf32>, vector<128x256xf32>, vector<32x256xf32> -> vector<32x256xf32>
    %75 = arith.addf %68, %74 : vector<32x256xf32>
    %76 = arith.mulf %75, %75 : vector<32x256xf32>
    %c0_72 = arith.constant 0 : index
    %c0_73 = arith.constant 0 : index
    %77 = vector.load %arg9[%c0_72, %c0_73] : memref<256x256xf32, #tpu.memory_space<vmem>>, vector<256x256xf32>
    %cst_74 = arith.constant dense<0.000000e+00> : vector<32x256xf32>
    %78 = tpu.matmul %76, %77, %cst_74 {dimension_numbers = #tpu.dot_dimension_numbers<[1], [0], [0], [1], [0, 0, 1, 1], [], []>} : vector<32x256xf32>, vector<256x256xf32>, vector<32x256xf32> -> vector<32x256xf32>
    %cst_75 = arith.constant 1.000000e-24 : f32
    %79 = vector.broadcast %cst_75 : f32 to vector<32x256xf32>
    %80 = arith.maximumf %78, %79 : vector<32x256xf32>
    %81 = math.rsqrt %80 : vector<32x256xf32>
    %82 = arith.mulf %75, %81 : vector<32x256xf32>
    %83 = math.tanh %82 : vector<32x256xf32>
    %c0_76 = arith.constant 0 : index
    %c0_77 = arith.constant 0 : index
    %84 = vector.load %arg13[%c0_76, %c0_77] : memref<32x256xf32, #tpu.memory_space<vmem>>, vector<32x256xf32>
    tpu.vector_store %arg13[%c0_76, %c0_77], %83 {strides = array<i32>} : memref<32x256xf32, #tpu.memory_space<vmem>>, vector<32x256xf32>,
    %c0_78 = arith.constant 0 : index
    %c0_79 = arith.constant 0 : index
    %85 = vector.load %arg10[%c0_78, %c0_79] : memref<16x32xf32, #tpu.memory_space<vmem>>, vector<16x32xf32>
    %cst_80 = arith.constant dense<0.000000e+00> : vector<16x256xf32>
    %86 = tpu.matmul %85, %83, %cst_80 {dimension_numbers = #tpu.dot_dimension_numbers<[1], [0], [0], [1], [0, 0, 1, 1], [], []>} : vector<16x32xf32>, vector<32x256xf32>, vector<16x256xf32> -> vector<16x256xf32>
    %c0_81 = arith.constant 0 : index
    %c0_82 = arith.constant 0 : index
    %87 = vector.load %arg11[%c0_81, %c0_82] : memref<1x256xf32, #tpu.memory_space<vmem>>, vector<1x256xf32>
    %88 = vector.broadcast %87 : vector<1x256xf32> to vector<16x256xf32>
    %89 = arith.mulf %86, %88 : vector<16x256xf32>
    %cst_83 = arith.constant dense<0.000000e+00> : vector<16xf32>
    %90 = vector.multi_reduction <add>, %89, %cst_83 [1] : vector<16x256xf32> to vector<16xf32>
    %91 = vector.shape_cast %90 : vector<16xf32> to vector<16x1xf32>
    %c0_84 = arith.constant 0 : index
    %c0_85 = arith.constant 0 : index
    %92 = vector.load %arg12[%c0_84, %c0_85] : memref<16x1xf32, #tpu.memory_space<vmem>>, vector<16x1xf32>
    %93 = math.absf %91 : vector<16x1xf32>
    %cst_86 = arith.constant 0.000000e+00 : f32
    %94 = vector.broadcast %cst_86 : f32 to vector<16x1xf32>
    %95 = arith.subf %94, %93 : vector<16x1xf32>
    %96 = math.exp %95 : vector<16x1xf32>
    %97 = math.log1p %96 : vector<16x1xf32>
    %cst_87 = arith.constant 0.000000e+00 : f32
    %98 = vector.broadcast %cst_87 : f32 to vector<16x1xf32>
    %99 = arith.minimumf %91, %98 : vector<16x1xf32>
    %100 = arith.subf %99, %97 : vector<16x1xf32>
    %cst_88 = arith.constant -1.000000e+02 : f32
    %101 = vector.broadcast %cst_88 : f32 to vector<16x1xf32>
    %102 = arith.maximumf %100, %101 : vector<16x1xf32>
    %cst_89 = arith.constant 0.000000e+00 : f32
    %103 = vector.broadcast %cst_89 : f32 to vector<16x1xf32>
    %104 = arith.subf %103, %91 : vector<16x1xf32>
    %cst_90 = arith.constant 0.000000e+00 : f32
    %105 = vector.broadcast %cst_90 : f32 to vector<16x1xf32>
    %106 = arith.minimumf %104, %105 : vector<16x1xf32>
    %107 = arith.subf %106, %97 : vector<16x1xf32>
    %cst_91 = arith.constant -1.000000e+02 : f32
    %108 = vector.broadcast %cst_91 : f32 to vector<16x1xf32>
    %109 = arith.maximumf %107, %108 : vector<16x1xf32>
    %110 = arith.mulf %92, %102 : vector<16x1xf32>
    %cst_92 = arith.constant 1.000000e+00 : f32
    %111 = vector.broadcast %cst_92 : f32 to vector<16x1xf32>
    %112 = arith.subf %111, %92 : vector<16x1xf32>
    %113 = arith.mulf %112, %109 : vector<16x1xf32>
    %114 = arith.addf %110, %113 : vector<16x1xf32>
    %115 = vector.shape_cast %114 : vector<16x1xf32> to vector<1x16x1xf32>
    %cst_93 = arith.constant dense<0.000000e+00> : vector<1xf32>
    %116 = vector.multi_reduction <add>, %115, %cst_93 [1, 2] : vector<1x16x1xf32> to vector<1xf32>
    %117 = vector.shape_cast %116 : vector<1xf32> to vector<1x1x1xf32>
    %118 = vector.extract %117[0, 0, 0] : f32 from vector<1x1x1xf32>
    %cst_94 = arith.constant 1.600000e+01 : f32
    %119 = arith.divf %118, %cst_94 : f32
    %cst_95 = arith.constant 0.000000e+00 : f32
    %120 = arith.subf %cst_95, %119 : f32
    %c0_96 = arith.constant 0 : index
    %c0_97 = arith.constant 0 : index
    %121 = vector.load %arg11[%c0_96, %c0_97] : memref<1x256xf32, #tpu.memory_space<vmem>>, vector<1x256xf32>
    %122 = math.absf %121 : vector<1x256xf32>
    %123 = vector.shape_cast %122 : vector<1x256xf32> to vector<1x1x256xf32>
    %cst_98 = arith.constant dense<0.000000e+00> : vector<1xf32>
    %124 = vector.multi_reduction <add>, %123, %cst_98 [1, 2] : vector<1x1x256xf32> to vector<1xf32>
    %125 = vector.shape_cast %124 : vector<1xf32> to vector<1x1x1xf32>
    %126 = vector.extract %125[0, 0, 0] : f32 from vector<1x1x1xf32>
    %cst_99 = arith.constant 2.560000e+02 : f32
    %127 = arith.divf %126, %cst_99 : f32
    %cst_100 = arith.constant 0.000000e+00 : f32
    %128 = arith.addf %120, %cst_100 : f32
    %cst_101 = arith.constant 0.00999999977 : f32
    %129 = arith.mulf %cst_101, %127 : f32
    %130 = arith.addf %128, %129 : f32
    %131 = vector.broadcast %130 : f32 to vector<1x1xf32>
    %c0_102 = arith.constant 0 : index
    %c0_103 = arith.constant 0 : index
    %132 = vector.load %arg14[%c0_102, %c0_103] : memref<1x1xf32, #tpu.memory_space<vmem>>, vector<1x1xf32>
    tpu.vector_store %arg14[%c0_102, %c0_103], %131 {strides = array<i32>} : memref<1x1xf32, #tpu.memory_space<vmem>>, vector<1x1xf32>,
    return
  }
  func.func @transform_0(%arg0: i32) -> (i32, i32, i32) {
    %c0_i32 = arith.constant 0 : i32
    %c0_i32_0 = arith.constant 0 : i32
    %c0_i32_1 = arith.constant 0 : i32
    %c0_i32_2 = arith.constant 0 : i32
    return %c0_i32, %c0_i32_0, %c0_i32_1 : i32, i32, i32
  }
  func.func @transform_1(%arg0: i32) -> (i32, i32) {
    %c0_i32 = arith.constant 0 : i32
    %c0_i32_0 = arith.constant 0 : i32
    %c0_i32_1 = arith.constant 0 : i32
    return %c0_i32, %c0_i32_0 : i32, i32
  }
  func.func @transform_2(%arg0: i32) -> (i32, i32, i32) {
    %c0_i32 = arith.constant 0 : i32
    %c0_i32_0 = arith.constant 0 : i32
    %c0_i32_1 = arith.constant 0 : i32
    %c0_i32_2 = arith.constant 0 : i32
    return %c0_i32, %c0_i32_0, %c0_i32_1 : i32, i32, i32
  }
  func.func @transform_3(%arg0: i32) -> (i32, i32) {
    %c0_i32 = arith.constant 0 : i32
    %c0_i32_0 = arith.constant 0 : i32
    %c0_i32_1 = arith.constant 0 : i32
    return %c0_i32, %c0_i32_0 : i32, i32
  }
  func.func @transform_4(%arg0: i32) -> (i32, i32) {
    %c0_i32 = arith.constant 0 : i32
    %c0_i32_0 = arith.constant 0 : i32
    %c0_i32_1 = arith.constant 0 : i32
    return %c0_i32, %c0_i32_0 : i32, i32
  }
  func.func @transform_5(%arg0: i32) -> (i32, i32, i32) {
    %c0_i32 = arith.constant 0 : i32
    %c0_i32_0 = arith.constant 0 : i32
    %c0_i32_1 = arith.constant 0 : i32
    %c0_i32_2 = arith.constant 0 : i32
    return %c0_i32, %c0_i32_0, %c0_i32_1 : i32, i32, i32
  }
  func.func @transform_6(%arg0: i32) -> (i32, i32) {
    %c0_i32 = arith.constant 0 : i32
    %c0_i32_0 = arith.constant 0 : i32
    %c0_i32_1 = arith.constant 0 : i32
    return %c0_i32, %c0_i32_0 : i32, i32
  }
  func.func @transform_7(%arg0: i32) -> (i32, i32) {
    %c0_i32 = arith.constant 0 : i32
    %c0_i32_0 = arith.constant 0 : i32
    %c0_i32_1 = arith.constant 0 : i32
    return %c0_i32, %c0_i32_0 : i32, i32
  }
  func.func @transform_8(%arg0: i32) -> (i32, i32) {
    %c0_i32 = arith.constant 0 : i32
    %c0_i32_0 = arith.constant 0 : i32
    %c0_i32_1 = arith.constant 0 : i32
    return %c0_i32, %c0_i32_0 : i32, i32
  }
  func.func @transform_9(%arg0: i32) -> (i32, i32) {
    %c0_i32 = arith.constant 0 : i32
    %c0_i32_0 = arith.constant 0 : i32
    %c0_i32_1 = arith.constant 0 : i32
    return %c0_i32, %c0_i32_0 : i32, i32
  }
  func.func @transform_10(%arg0: i32) -> (i32, i32) {
    %c0_i32 = arith.constant 0 : i32
    %c0_i32_0 = arith.constant 0 : i32
    %c0_i32_1 = arith.constant 0 : i32
    return %c0_i32, %c0_i32_0 : i32, i32
  }
  func.func @transform_11(%arg0: i32) -> (i32, i32) {
    %c0_i32 = arith.constant 0 : i32
    %c0_i32_0 = arith.constant 0 : i32
    %c0_i32_1 = arith.constant 0 : i32
    return %c0_i32, %c0_i32_0 : i32, i32
  }
  func.func @transform_12(%arg0: i32) -> (i32, i32) {
    %c0_i32 = arith.constant 0 : i32
    %c0_i32_0 = arith.constant 0 : i32
    %c0_i32_1 = arith.constant 0 : i32
    return %c0_i32, %c0_i32_0 : i32, i32
  }
  func.func @transform_13(%arg0: i32) -> (i32, i32) {
    %c0_i32 = arith.constant 0 : i32
    %c0_i32_0 = arith.constant 0 : i32
    %c0_i32_1 = arith.constant 0 : i32
    return %c0_i32, %c0_i32_0 : i32, i32
  }
}

</mosaic_0001>

<bundles_post_ra>
// kernel: sgcn_forward.1
= control target key start
LH: loop header
LB: loop body
LE: loop exit
PB: predicated region body
PF: predicated region fallthrough
CT: control target
= control target key end

     0   :  { %19 = vsyncpa [#allocation3], 0  ;;  %vm58_vm0 = vcmask 130048   ;;  %vm160_vm1 = vcmask 261120   ;;  %s4450_s0 = inlined_call_operand.vmem [shape: f32[8,32,32], index: 0, kind: input, shape index: {}]   ;;  %s4451_s1 = inlined_call_operand.vmem [shape: f32[32,16], index: 1, kind: input, shape index: {}]   ;;  %s4452_s2 = inlined_call_operand.vmem [shape: f32[4,16,128], index: 2, kind: input, shape index: {}]   ;;  %s4453_s3 = inlined_call_operand.vmem [shape: f32[16,128], index: 3, kind: input, shape index: {}]   ;;  %s4454_s4 = inlined_call_operand.vmem [shape: f32[1,128], index: 4, kind: input, shape index: {}]   ;;  %s4455_s5 = inlined_call_operand.vmem [shape: f32[5,128,256], index: 5, kind: input, shape index: {}]   ;;  %s4456_s6 = inlined_call_operand.vmem [shape: f32[1,256], index: 6, kind: input, shape index: {}]   ;;  %s4457_s7 = inlined_call_operand.vmem [shape: f32[128,128], index: 7, kind: input, shape index: {}]   ;;  %s4458_s8 = inlined_call_operand.vmem [shape: f32[256,256], index: 8, kind: input, shape index: {}]   ;;  %s4459_s9 = inlined_call_operand.vmem [shape: f32[16,32], index: 9, kind: input, shape index: {}]   ;;  %s4460_s10 = inlined_call_operand.vmem [shape: f32[1,256], index: 10, kind: input, shape index: {}]   ;;  %s4461_s11 = inlined_call_operand.vmem [shape: f32[16,1], index: 11, kind: input, shape index: {}]   ;;  %s4462_s12 = inlined_call_operand.hbm [shape: f32[32,256], index: 12, kind: output, shape index: {0}]   ;;  %s4463_s13 = inlined_call_operand.hbm [shape: f32[1,1], index: 13, kind: output, shape index: {1}]  }
   0x1   :  { %v50_v0 = vld [vmem:[%s4453_s3 + $0x8] sm:$0xff]  ;;  %v49_v1 = vld [vmem:[%s4453_s3] sm:$0xff]  ;;  %v48_v4 = vld [vmem:[%s4451_s1 + $0x18] sm:$0xff] }
   0x2   :  { %v3332_v2 = vld [vmem:[%s4451_s1] sm:$0xff]  ;;  %2931 = vmatprep.subr.mxu1 %v50_v0  ;;  %v3339_v3 = vld [vmem:[%s4451_s1 + $0x8] sm:$0xff]  ;;  %v47_v5 = vld [vmem:[%s4451_s1 + $0x10] sm:$0xff] }
   0x3   :  { %2935 = vmatprep.mubr.msk.f32.mxu1 %vm58_vm0, %v3332_v2  ;;  %2932 = vmatpush3.msra.mxu1 %v50_v0  ;;  %v156_v6 = vld [vmem:[%s4450_s0] sm:$0xff] }
   0x4   :  { %2933 = vmatprep.subr.mxu1 %v49_v1 }
   0x5   :  { %2934 = vmatpush3.msra.mxu1 %v49_v1 }
   0x6   :  { %2936 = vmatmul.mubr.msk.f32.vlgmr.msra.gmra.mxu1 %vm58_vm0, %v3339_v3  ;;  %2941 = vmatprep.subr.mxu1 %v48_v4 }
   0x7   :  { %2942 = vmatpush3.msra.mxu1 %v48_v4  ;;  %2938 = vmatprep.mubr.msk.f32.mxu1 %vm58_vm0, %v47_v5 }
   0x8   :  { %2943 = vmatprep.subr.mxu1 %v47_v5 }
   0x9   :  { %20 = vsyncpa [#allocation5], 0  ;;  %2944 = vmatpush3.msra.mxu1 %v47_v5  ;;  %v157_v7 = vld [vmem:[%s4450_s0 + $0x8] sm:$0xff]  ;;  %v158_v8 = vld [vmem:[%s4450_s0 + $0x10] sm:$0xff]  ;;  %vm2519_vm4 = vcmask 7168   ;;  %vm2548_vm5 = vcmask 1040384  }
   0xa   :  { %2939 = vmatmul.mubr.msk.f32.gmra.mxu1 %vm58_vm0, %v48_v4  ;;  %2945 = vmatprep.subr.mxu1 %v3339_v3  ;;  %v159_v9 = vld [vmem:[%s4450_s0 + $0x18] sm:$0xff]  ;;  %v2613_v10 = vld [vmem:[%s4450_s0 + $0x20] sm:$0xff]  ;;  %v2614_v11 = vld [vmem:[%s4450_s0 + $0x28] sm:$0xff] }
   0xb   :  { %2946 = vmatpush3.msra.mxu1 %v3339_v3  ;;  %2949 = vmatprep.mubr.msk.f32.mxu1 %vm160_vm1, %v156_v6  ;;  %v2615_v12 = vld [vmem:[%s4450_s0 + $0x30] sm:$0xff]  ;;  %v2616_v13 = vld [vmem:[%s4450_s0 + $0x38] sm:$0xff]  ;;  %v2627_v14 = vld [vmem:[%s4450_s0 + $0x40] sm:$0xff] }
   0xc   :  { %2947 = vmatprep.subr.mxu1 %v3332_v2  ;;  %v2628_v15 = vld [vmem:[%s4450_s0 + $0x48] sm:$0xff]  ;;  %v2629_v16 = vld [vmem:[%s4450_s0 + $0x50] sm:$0xff]  ;;  %v2630_v17 = vld [vmem:[%s4450_s0 + $0x58] sm:$0xff] }
   0xd   :  { %2948 = vmatpush3.msra.mxu1 %v3332_v2  ;;  %v2641_v18 = vld [vmem:[%s4450_s0 + $0x60] sm:$0xff]  ;;  %v2642_v19 = vld [vmem:[%s4450_s0 + $0x68] sm:$0xff]  ;;  %v2643_v20 = vld [vmem:[%s4450_s0 + $0x70] sm:$0xff] }
   0xe   :  { %2950 = vmatmul.mubr.msk.f32.vlgmr.msra.gmra.mxu1 %vm160_vm1, %v157_v7  ;;  %2965 = vmatprep.subr.mxu1 %v48_v4  ;;  %v2644_v21 = vld [vmem:[%s4450_s0 + $0x78] sm:$0xff]  ;;  %v259_v22 = vld [vmem:[%s4452_s2 + $0x8] sm:$0xff]  ;;  %v258_v23 = vld [vmem:[%s4452_s2] sm:$0xff] }
   0xf   :  { %2966 = vmatpush3.msra.mxu1 %v48_v4  ;;  %2952 = vmatprep.mubr.msk.f32.mxu1 %vm160_vm1, %v158_v8  ;;  %v2622_v24 = vld [vmem:[%s4452_s2 + $0x18] sm:$0xff]  ;;  %v2621_v31 = vld [vmem:[%s4452_s2 + $0x10] sm:$0xff]  ;;  %v2636_v33 = vld [vmem:[%s4452_s2 + $0x28] sm:$0xff] }
  0x10   :  { %2967 = vmatprep.subr.mxu1 %v47_v5  ;;  %2955 = vmatprep.subr.mxu0 %v259_v22  ;;  %v2635_v37 = vld [vmem:[%s4452_s2 + $0x20] sm:$0xff]  ;;  %v2650_v39 = vld [vmem:[%s4452_s2 + $0x38] sm:$0xff]  ;;  %v2649_v43 = vld [vmem:[%s4452_s2 + $0x30] sm:$0xff] }
  0x11   :  { %2968 = vmatpush3.msra.mxu1 %v47_v5  ;;  %2956 = vmatpush3.msra.mxu0 %v259_v22  ;;  %v998_v50 = vld [vmem:[%s4457_s7 + $0x78] sm:$0xff]  ;;  %v997_v51 = vld [vmem:[%s4457_s7 + $0x70] sm:$0xff]  ;;  %v996_v52 = vld [vmem:[%s4457_s7 + $0x68] sm:$0xff] }
  0x12   :  { %2953 = vmatmul.mubr.msk.f32.gmra.mxu1 %vm160_vm1, %v159_v9  ;;  %2969 = vmatprep.subr.mxu1 %v3339_v3  ;;  %v995_v53 = vld [vmem:[%s4457_s7 + $0x60] sm:$0xff]  ;;  %v994_v54 = vld [vmem:[%s4457_s7 + $0x58] sm:$0xff]  ;;  %v993_v55 = vld [vmem:[%s4457_s7 + $0x50] sm:$0xff] }
  0x13   :  { %2970 = vmatpush3.msra.mxu1 %v3339_v3  ;;  %2973 = vmatprep.mubr.msk.f32.mxu1 %vm160_vm1, %v2613_v10  ;;  %v992_v56 = vld [vmem:[%s4457_s7 + $0x48] sm:$0xff]  ;;  %v991_v57 = vld [vmem:[%s4457_s7 + $0x40] sm:$0xff]  ;;  %v990_v58 = vld [vmem:[%s4457_s7 + $0x38] sm:$0xff] }
  0x14   :  { %2971 = vmatprep.subr.mxu1 %v3332_v2  ;;  %2957 = vmatprep.subr.mxu0 %v258_v23  ;;  %v989_v59 = vld [vmem:[%s4457_s7 + $0x30] sm:$0xff]  ;;  %v988_v60 = vld [vmem:[%s4457_s7 + $0x28] sm:$0xff]  ;;  %v987_v61 = vld [vmem:[%s4457_s7 + $0x20] sm:$0xff] }
  0x15   :  { %2972 = vmatpush3.msra.mxu1 %v3332_v2  ;;  %2958 = vmatpush3.msra.mxu0 %v258_v23  ;;  %v986_v62 = vld [vmem:[%s4457_s7 + $0x18] sm:$0xff]  ;;  %v985_v63 = vld [vmem:[%s4457_s7 + $0x10] sm:$0xff]  ;;  %v984_v0 = vld [vmem:[%s4457_s7 + $0x8] sm:$0xff] }
  0x16   :  { %2974 = vmatmul.mubr.msk.f32.vlgmr.msra.gmra.mxu1 %vm160_vm1, %v2614_v11  ;;  %2989 = vmatprep.subr.mxu1 %v48_v4  ;;  %v983_v1 = vld [vmem:[%s4457_s7] sm:$0xff] }
  0x17   :  { %2990 = vmatpush3.msra.mxu1 %v48_v4  ;;  %2976 = vmatprep.mubr.msk.f32.mxu1 %vm160_vm1, %v2615_v12  ;;  %v2600_v10 = vld [vmem:[%s4454_s4] ss:$0 sm:$0xff] }
  0x18   :  { %2991 = vmatprep.subr.mxu1 %v47_v5  ;;  %2979 = vmatprep.subr.mxu0 %v2622_v24 }
  0x19   :  { %2992 = vmatpush3.msra.mxu1 %v47_v5 }
  0x1a   :  { %2977 = vmatmul.mubr.msk.f32.gmra.mxu1 %vm160_vm1, %v2616_v13  ;;  %2993 = vmatprep.subr.mxu1 %v3339_v3 }
  0x1b   :  { %2994 = vmatpush3.msra.mxu1 %v3339_v3  ;;  %2997 = vmatprep.mubr.msk.f32.mxu1 %vm160_vm1, %v2627_v14 }
  0x1c   :  { %2995 = vmatprep.subr.mxu1 %v3332_v2 }
  0x1d   :  { %2996 = vmatpush3.msra.mxu1 %v3332_v2 }
  0x1e   :  { %2998 = vmatmul.mubr.msk.f32.vlgmr.msra.gmra.mxu1 %vm160_vm1, %v2628_v15  ;;  %3013 = vmatprep.subr.mxu1 %v48_v4 }
  0x1f   :  { %3014 = vmatpush3.msra.mxu1 %v48_v4  ;;  %3000 = vmatprep.mubr.msk.f32.mxu1 %vm160_vm1, %v2629_v16 }
  0x20   :  { %3015 = vmatprep.subr.mxu1 %v47_v5 }
  0x21   :  { %3016 = vmatpush3.msra.mxu1 %v47_v5 }
  0x22   :  { %3001 = vmatmul.mubr.msk.f32.gmra.mxu1 %vm160_vm1, %v2630_v17  ;;  %3017 = vmatprep.subr.mxu1 %v3339_v3 }
  0x23   :  { %3018 = vmatpush3.msra.mxu1 %v3339_v3  ;;  %3021 = vmatprep.mubr.msk.f32.mxu1 %vm160_vm1, %v2641_v18 }
  0x24   :  { %3019 = vmatprep.subr.mxu1 %v3332_v2 }
  0x25   :  { %3020 = vmatpush3.msra.mxu1 %v3332_v2 }
  0x26   :  { %3022 = vmatmul.mubr.msk.f32.vlgmr.msra.gmra.mxu1 %vm160_vm1, %v2642_v19 }
  0x27   :  { %3024 = vmatprep.mubr.msk.f32.mxu1 %vm160_vm1, %v2643_v20 }
  0x2a   :  { %3025 = vmatmul.mubr.msk.f32.gmra.mxu1 %vm160_vm1, %v2644_v21 }
  0xc6   :  { %v3440_v25 = vpop.f32.mrf.mxu1 }
  0xc7   :  { %v143_v12 = vadd.f32 %v3440_v25, %v2600_v10 }
  0xc8   :  { %v3442_v26 = vpop.f32.mrf.mxu1 }
  0xc9   :  { %v138_v14 = vadd.f32 %v2600_v10, %v3442_v26 }
  0xca   :  { %v3444_v27 = vpop.f32.mrf.mxu1 }
  0xcb   :  { %v153_v18 = vadd.f32 %v3444_v27, %v2600_v10 }
  0xcc   :  { %v3446_v28 = vpop.f32.mrf.mxu1 }
  0xcd   :  { %v148_v21 = vadd.f32 %v2600_v10, %v3446_v28  ;;  %v2656_v10 = vld [vmem:[%s4455_s5 + $0x408] sm:$0xff] }
  0xce   :  { %v2951_v29 = vpop.f32.mrf.mxu1 }
  0xd0   :  { %v239_v30 = vpop.f32.mrf.mxu1 }
  0xd1   :  { %2959 = vmatprep.mubr.msk.f32.mxu0 %vm58_vm0, %v239_v30 }
  0xd2   :  { %v2954_v32 = vpop.f32.mrf.mxu1  ;;  %2960 = vmatmul.mubr.msk.f32.vlgmr.msra.gmra.mxu0 %vm58_vm0, %v2951_v29 }
  0xd3   :  { %2980 = vmatpush3.msra.mxu0 %v2622_v24 }
  0xd4   :  { %v249_v34 = vpop.f32.mrf.mxu1  ;;  %2981 = vmatprep.subr.mxu0 %v2621_v31 }
  0xd5   :  { %2962 = vmatprep.mubr.msk.f32.mxu0 %vm58_vm0, %v249_v34  ;;  %2982 = vmatpush3.msra.mxu0 %v2621_v31 }
  0xd6   :  { %2963 = vmatmul.mubr.msk.f32.gmra.mxu0 %vm58_vm0, %v2954_v32  ;;  %v2975_v35 = vpop.f32.mrf.mxu1  ;;  %3003 = vmatprep.subr.mxu0 %v2636_v33 }
  0xd8   :  { %v444_v36 = vpop.f32.mrf.mxu1 }
  0xd9   :  { %2983 = vmatprep.mubr.msk.f32.mxu0 %vm58_vm0, %v444_v36 }
  0xda   :  { %v2978_v38 = vpop.f32.mrf.mxu1  ;;  %2984 = vmatmul.mubr.msk.f32.vlgmr.msra.gmra.mxu0 %vm58_vm0, %v2975_v35 }
  0xdb   :  { %3004 = vmatpush3.msra.mxu0 %v2636_v33 }
  0xdc   :  { %v454_v40 = vpop.f32.mrf.mxu1  ;;  %3005 = vmatprep.subr.mxu0 %v2635_v37 }
  0xdd   :  { %2986 = vmatprep.mubr.msk.f32.mxu0 %vm58_vm0, %v454_v40  ;;  %3006 = vmatpush3.msra.mxu0 %v2635_v37 }
  0xde   :  { %2987 = vmatmul.mubr.msk.f32.gmra.mxu0 %vm58_vm0, %v2978_v38  ;;  %v2999_v41 = vpop.f32.mrf.mxu1  ;;  %3027 = vmatprep.subr.mxu0 %v2650_v39 }
  0xe0   :  { %v650_v42 = vpop.f32.mrf.mxu1 }
  0xe1   :  { %3007 = vmatprep.mubr.msk.f32.mxu0 %vm58_vm0, %v650_v42 }
  0xe2   :  { %v3002_v44 = vpop.f32.mrf.mxu1  ;;  %3008 = vmatmul.mubr.msk.f32.vlgmr.msra.gmra.mxu0 %vm58_vm0, %v2999_v41 }
  0xe3   :  { %3028 = vmatpush3.msra.mxu0 %v2650_v39 }
  0xe4   :  { %v660_v45 = vpop.f32.mrf.mxu1  ;;  %3029 = vmatprep.subr.mxu0 %v2649_v43 }
  0xe5   :  { %3010 = vmatprep.mubr.msk.f32.mxu0 %vm58_vm0, %v660_v45  ;;  %3030 = vmatpush3.msra.mxu0 %v2649_v43  ;;  %v2686_v43 = vld [vmem:[%s4455_s5 + $0x4f8] sm:$0xff]  ;;  %v2684_v45 = vld [vmem:[%s4455_s5 + $0x4e8] sm:$0xff] }
  0xe6   :  { %3011 = vmatmul.mubr.msk.f32.gmra.mxu0 %vm58_vm0, %v3002_v44  ;;  %v3023_v46 = vpop.f32.mrf.mxu1  ;;  %3037 = vmatprep.subr.mxu0 %v998_v50  ;;  %v2685_v44 = vld [vmem:[%s4455_s5 + $0x4f0] sm:$0xff] }
  0xe8   :  { %v856_v47 = vpop.f32.mrf.mxu1 }
  0xe9   :  { %3031 = vmatprep.mubr.msk.f32.mxu0 %vm58_vm0, %v856_v47  ;;  %v2682_v47 = vld [vmem:[%s4455_s5 + $0x4d8] sm:$0xff] }
  0xea   :  { %v3026_v48 = vpop.f32.mrf.mxu1  ;;  %3032 = vmatmul.mubr.msk.f32.vlgmr.msra.gmra.mxu0 %vm58_vm0, %v3023_v46  ;;  %v2683_v46 = vld [vmem:[%s4455_s5 + $0x4e0] sm:$0xff] }
  0xeb   :  { %3038 = vmatpush3.msra.mxu0 %v998_v50  ;;  %v2679_v50 = vld [vmem:[%s4455_s5 + $0x4c0] sm:$0xff] }
  0xec   :  { %v866_v49 = vpop.f32.mrf.mxu1  ;;  %3039 = vmatprep.subr.mxu0 %v997_v51 }
  0xed   :  { %3034 = vmatprep.mubr.msk.f32.mxu0 %vm58_vm0, %v866_v49  ;;  %3040 = vmatpush3.msra.mxu0 %v997_v51  ;;  %v2680_v49 = vld [vmem:[%s4455_s5 + $0x4c8] sm:$0xff]  ;;  %v2678_v51 = vld [vmem:[%s4455_s5 + $0x4b8] sm:$0xff] }
  0xee   :  { %3035 = vmatmul.mubr.msk.f32.gmra.mxu0 %vm58_vm0, %v3026_v48  ;;  %3041 = vmatprep.subr.mxu0 %v996_v52  ;;  %v2681_v48 = vld [vmem:[%s4455_s5 + $0x4d0] sm:$0xff] }
  0xef   :  { %3042 = vmatpush3.msra.mxu0 %v996_v52  ;;  %v2677_v52 = vld [vmem:[%s4455_s5 + $0x4b0] sm:$0xff] }
  0xf0   :  { %3043 = vmatprep.subr.mxu0 %v995_v53 }
  0xf1   :  { %3044 = vmatpush3.msra.mxu0 %v995_v53  ;;  %v2676_v53 = vld [vmem:[%s4455_s5 + $0x4a8] sm:$0xff] }
  0xf2   :  { %3045 = vmatprep.subr.mxu0 %v994_v54 }
  0xf3   :  { %3046 = vmatpush3.msra.mxu0 %v994_v54  ;;  %v2675_v54 = vld [vmem:[%s4455_s5 + $0x4a0] sm:$0xff] }
  0xf4   :  { %3047 = vmatprep.subr.mxu0 %v993_v55 }
  0xf5   :  { %3048 = vmatpush3.msra.mxu0 %v993_v55  ;;  %v2674_v55 = vld [vmem:[%s4455_s5 + $0x498] sm:$0xff] }
  0xf6   :  { %3049 = vmatprep.subr.mxu0 %v992_v56 }
  0xf7   :  { %3050 = vmatpush3.msra.mxu0 %v992_v56  ;;  %v2673_v56 = vld [vmem:[%s4455_s5 + $0x490] sm:$0xff] }
  0xf8   :  { %3051 = vmatprep.subr.mxu0 %v991_v57 }
  0xf9   :  { %3052 = vmatpush3.msra.mxu0 %v991_v57  ;;  %v2672_v57 = vld [vmem:[%s4455_s5 + $0x488] sm:$0xff] }
  0xfa   :  { %3053 = vmatprep.subr.mxu0 %v990_v58 }
  0xfb   :  { %3054 = vmatpush3.msra.mxu0 %v990_v58  ;;  %v2671_v58 = vld [vmem:[%s4455_s5 + $0x480] sm:$0xff] }
  0xfc   :  { %3055 = vmatprep.subr.mxu0 %v989_v59 }
  0xfd   :  { %3056 = vmatpush3.msra.mxu0 %v989_v59  ;;  %v2670_v59 = vld [vmem:[%s4455_s5 + $0x478] sm:$0xff] }
  0xfe   :  { %3057 = vmatprep.subr.mxu0 %v988_v60 }
  0xff   :  { %3058 = vmatpush3.msra.mxu0 %v988_v60  ;;  %v2669_v60 = vld [vmem:[%s4455_s5 + $0x470] sm:$0xff] }
 0x100   :  { %3059 = vmatprep.subr.mxu0 %v987_v61 }
 0x101   :  { %3060 = vmatpush3.msra.mxu0 %v987_v61  ;;  %v2668_v61 = vld [vmem:[%s4455_s5 + $0x468] sm:$0xff] }
 0x102   :  { %3061 = vmatprep.subr.mxu0 %v986_v62 }
 0x103   :  { %3062 = vmatpush3.msra.mxu0 %v986_v62  ;;  %v2667_v62 = vld [vmem:[%s4455_s5 + $0x460] sm:$0xff] }
 0x104   :  { %3063 = vmatprep.subr.mxu0 %v985_v63 }
 0x105   :  { %3064 = vmatpush3.msra.mxu0 %v985_v63  ;;  %v2666_v63 = vld [vmem:[%s4455_s5 + $0x458] sm:$0xff] }
 0x106   :  { %3065 = vmatprep.subr.mxu0 %v984_v0 }
 0x107   :  { %3066 = vmatpush3.msra.mxu0 %v984_v0  ;;  %v2665_v0 = vld [vmem:[%s4455_s5 + $0x450] sm:$0xff] }
 0x108   :  { %3067 = vmatprep.subr.mxu0 %v983_v1 }
 0x109   :  { %3068 = vmatpush3.msra.mxu0 %v983_v1  ;;  %v2664_v1 = vld [vmem:[%s4455_s5 + $0x448] sm:$0xff] }
 0x10a   :  { %1145 = vmatprep.subr.mxu0 %v2686_v43  ;;  %v1357_v43 = vld [vmem:[%s4455_s5 + $0xa8] sm:$0xff] }
 0x192   :  { %v2961_v2 = vpop.f32.mrf.mxu0 }
 0x193   :  { %v358_v15 = vadd.f32 %v2961_v2, %v143_v12  ;;  %v2663_v2 = vld [vmem:[%s4455_s5 + $0x440] sm:$0xff]  ;;  %v1367_v12 = vld [vmem:[%s4455_s5 + $0xf8] sm:$0xff] }
 0x194   :  { %v338_v3 = vpop.f32.mrf.mxu0 }
 0x195   :  { %v357_v17 = vadd.f32 %v338_v3, %v138_v14  ;;  %v2662_v3 = vld [vmem:[%s4455_s5 + $0x438] sm:$0xff] }
 0x196   :  { %v2964_v4 = vpop.f32.mrf.mxu0 }
 0x197   :  { %v360_v23 = vadd.f32 %v2964_v4, %v153_v18  ;;  %v2661_v4 = vld [vmem:[%s4455_s5 + $0x430] sm:$0xff] }
 0x198   :  { %v348_v5 = vpop.f32.mrf.mxu0 }
 0x199   :  { %v359_v30 = vadd.f32 %v348_v5, %v148_v21  ;;  %v2660_v5 = vld [vmem:[%s4455_s5 + $0x428] sm:$0xff] }
 0x19a   :  { %v2985_v6 = vpop.f32.mrf.mxu0 }
 0x19b   :  { %v564_v19 = vadd.f32 %v2985_v6, %v358_v15  ;;  %v2659_v6 = vld [vmem:[%s4455_s5 + $0x420] sm:$0xff] }
 0x19c   :  { %v544_v7 = vpop.f32.mrf.mxu0 }
 0x19d   :  { %v563_v22 = vadd.f32 %v544_v7, %v357_v17  ;;  %v3248_v7 = vmov 0.0  }
 0x19e   :  { %v2988_v8 = vpop.f32.mrf.mxu0 }
 0x19f   :  { %v566_v32 = vadd.f32 %v2988_v8, %v360_v23  ;;  %v2658_v8 = vld [vmem:[%s4455_s5 + $0x418] sm:$0xff] }
 0x1a0   :  { %v554_v9 = vpop.f32.mrf.mxu0 }
 0x1a1   :  { %v565_v26 = vadd.f32 %v554_v9, %v359_v30  ;;  %v2657_v9 = vld [vmem:[%s4455_s5 + $0x410] sm:$0xff] }
 0x1a2   :  { %v3009_v11 = vpop.f32.mrf.mxu0 }
 0x1a3   :  { %v770_v24 = vadd.f32 %v3009_v11, %v564_v19  ;;  %v2655_v11 = vld [vmem:[%s4455_s5 + $0x400] sm:$0xff] }
 0x1a4   :  { %v750_v13 = vpop.f32.mrf.mxu0 }
 0x1a5   :  { %v769_v31 = vadd.f32 %v750_v13, %v563_v22  ;;  %v2687_v13 = vld [vmem:[%s4450_s0 + $0x80] sm:$0xff] }
 0x1a6   :  { %v3012_v16 = vpop.f32.mrf.mxu0  ;;  %3083 = vmatprep.mubr.msk.f32.mxu1 %vm160_vm1, %v2687_v13  ;;  %v1338_v13 = vld [vmem:[%s4455_s5 + $0x10] sm:$0xff] }
 0x1a7   :  { %v772_v35 = vadd.f32 %v3012_v16, %v566_v32 }
 0x1a8   :  { %v760_v20 = vpop.f32.mrf.mxu0 }
 0x1a9   :  { %v771_v27 = vadd.f32 %v760_v20, %v565_v26  ;;  %v1366_v26 = vld [vmem:[%s4455_s5 + $0xf0] sm:$0xff] }
 0x1aa   :  { %v3033_v29 = vpop.f32.mrf.mxu0 }
 0x1ab   :  { %v3534_v25 = vadd.f32 %v3033_v29, %v770_v24 }
 0x1ac   :  { %v956_v33 = vpop.f32.mrf.mxu0 }
 0x1ad   :  { %v3536_v34 = vadd.f32 %v956_v33, %v769_v31  ;;  %v980_v28 = vmul.f32 %v3534_v25, %v3534_v25 }
 0x1ae   :  { %v3036_v36 = vpop.f32.mrf.mxu0 }
 0x1af   :  { %v979_v37 = vmul.f32 %v3536_v34, %v3536_v34  ;;  %v3542_v38 = vadd.f32 %v3036_v36, %v772_v35 }
 0x1b0   :  { %v966_v39 = vpop.f32.mrf.mxu0 }
 0x1b1   :  { %v3544_v40 = vadd.f32 %v966_v39, %v771_v27  ;;  %3069 = vmatprep.mubr.f32.mxu0 %v979_v37  ;;  %v982_v42 = vmul.f32 %v3542_v38, %v3542_v38  ;;  %v1363_v27 = vld [vmem:[%s4455_s5 + $0xd8] sm:$0xff]  ;;  %v1361_v39 = vld [vmem:[%s4455_s5 + $0xc8] sm:$0xff] }
 0x1b2   :  { %3070 = vmatmul.mubr.f32.vlgmr.msra.gmra.mxu0 %v980_v28  ;;  %v1362_v28 = vld [vmem:[%s4455_s5 + $0xd0] sm:$0xff] }
 0x1b3   :  { %v981_v41 = vmul.f32 %v3544_v40, %v3544_v40  ;;  %1146 = vmatpush1.msra.mxu0 %v2685_v44  ;;  %v2688_v44 = vld [vmem:[%s4450_s0 + $0x88] sm:$0xff] }
 0x1b4   :  { %1147 = vmatprep.subr.mxu0 %v2684_v45  ;;  %v1356_v45 = vld [vmem:[%s4455_s5 + $0xa0] sm:$0xff] }
 0x1b5   :  { %3072 = vmatprep.mubr.f32.mxu0 %v981_v41  ;;  %1148 = vmatpush1.msra.mxu0 %v2683_v46  ;;  %v1359_v41 = vld [vmem:[%s4455_s5 + $0xb8] sm:$0xff] }
 0x1b6   :  { %3073 = vmatmul.mubr.f32.gmra.mxu0 %v982_v42  ;;  %1149 = vmatprep.subr.mxu0 %v2682_v47  ;;  %v1358_v42 = vld [vmem:[%s4455_s5 + $0xb0] sm:$0xff]  ;;  %v1355_v46 = vld [vmem:[%s4455_s5 + $0x98] sm:$0xff] }
 0x1b7   :  { %1150 = vmatpush1.msra.mxu0 %v2681_v48  ;;  %1209 = vmatprep.mubr.f32.mxu0 %v3248_v7  ;;  %v1354_v47 = vld [vmem:[%s4455_s5 + $0x90] sm:$0xff] }
 0x1b8   :  { %1151 = vmatprep.subr.mxu0 %v2680_v49  ;;  %v2689_v48 = vld [vmem:[%s4450_s0 + $0x90] sm:$0xff]  ;;  %v1353_v49 = vld [vmem:[%s4455_s5 + $0x88] sm:$0xff] }
 0x1b9   :  { %1152 = vmatpush1.msra.mxu0 %v2679_v50  ;;  %v2690_v50 = vld [vmem:[%s4450_s0 + $0x98] sm:$0xff] }
 0x1ba   :  { %1153 = vmatprep.subr.mxu0 %v2678_v51  ;;  %v1352_v51 = vld [vmem:[%s4455_s5 + $0x80] sm:$0xff] }
 0x1bb   :  { %1154 = vmatpush1.msra.mxu0 %v2677_v52  ;;  %v1351_v52 = vld [vmem:[%s4455_s5 + $0x78] sm:$0xff] }
 0x1bc   :  { %1155 = vmatprep.subr.mxu0 %v2676_v53  ;;  %v1350_v53 = vld [vmem:[%s4455_s5 + $0x70] sm:$0xff] }
 0x1bd   :  { %1156 = vmatpush1.msra.mxu0 %v2675_v54  ;;  %v1349_v54 = vld [vmem:[%s4455_s5 + $0x68] sm:$0xff] }
 0x1be   :  { %1157 = vmatprep.subr.mxu0 %v2674_v55  ;;  %v2695_v55 = vld [vmem:[%s4450_s0 + $0xa0] sm:$0xff] }
 0x1bf   :  { %1158 = vmatpush1.msra.mxu0 %v2673_v56  ;;  %v1348_v56 = vld [vmem:[%s4455_s5 + $0x60] sm:$0xff] }
 0x1c0   :  { %1159 = vmatprep.subr.mxu0 %v2672_v57  ;;  %v2696_v57 = vld [vmem:[%s4450_s0 + $0xa8] sm:$0xff] }
 0x1c1   :  { %1160 = vmatpush1.msra.mxu0 %v2671_v58  ;;  %v1347_v58 = vld [vmem:[%s4455_s5 + $0x58] sm:$0xff] }
 0x1c2   :  { %1161 = vmatprep.subr.mxu0 %v2670_v59  ;;  %v2697_v59 = vld [vmem:[%s4450_s0 + $0xb0] sm:$0xff] }
 0x1c3   :  { %1162 = vmatpush1.msra.mxu0 %v2669_v60  ;;  %v1346_v60 = vld [vmem:[%s4455_s5 + $0x50] sm:$0xff] }
 0x1c4   :  { %1163 = vmatprep.subr.mxu0 %v2668_v61  ;;  %v2734_v61 = vld [vmem:[%s4455_s5 + $0x1f8] sm:$0xff] }
 0x1c5   :  { %1164 = vmatpush1.msra.mxu0 %v2667_v62  ;;  %v1345_v62 = vld [vmem:[%s4455_s5 + $0x48] sm:$0xff] }
 0x1c6   :  { %1165 = vmatprep.subr.mxu0 %v2666_v63  ;;  %v2733_v63 = vld [vmem:[%s4455_s5 + $0x1f0] sm:$0xff] }
 0x1c7   :  { %1166 = vmatpush1.msra.mxu0 %v2665_v0  ;;  %v1344_v0 = vld [vmem:[%s4455_s5 + $0x40] sm:$0xff] }
 0x1c8   :  { %1167 = vmatprep.subr.mxu0 %v2664_v1  ;;  %v2698_v1 = vld [vmem:[%s4450_s0 + $0xb8] sm:$0xff] }
 0x1c9   :  { %1168 = vmatpush1.msra.mxu0 %v2663_v2  ;;  %v1343_v2 = vld [vmem:[%s4455_s5 + $0x38] sm:$0xff] }
 0x1ca   :  { %1169 = vmatprep.subr.mxu0 %v2662_v3  ;;  %v2732_v3 = vld [vmem:[%s4455_s5 + $0x1e8] sm:$0xff] }
 0x1cb   :  { %1170 = vmatpush1.msra.mxu0 %v2661_v4  ;;  %v1342_v4 = vld [vmem:[%s4455_s5 + $0x30] sm:$0xff] }
 0x1cc   :  { %1171 = vmatprep.subr.mxu0 %v2660_v5  ;;  %v2731_v5 = vld [vmem:[%s4455_s5 + $0x1e0] sm:$0xff] }
 0x1cd   :  { %1172 = vmatpush1.msra.mxu0 %v2659_v6  ;;  %v1341_v6 = vld [vmem:[%s4455_s5 + $0x28] sm:$0xff] }
 0x1ce   :  { %1173 = vmatprep.subr.mxu0 %v2658_v8  ;;  %v2730_v8 = vld [vmem:[%s4455_s5 + $0x1d8] sm:$0xff] }
 0x1cf   :  { %1174 = vmatpush1.msra.mxu0 %v2657_v9  ;;  %v1340_v9 = vld [vmem:[%s4455_s5 + $0x20] sm:$0xff] }
 0x1d0   :  { %1175 = vmatprep.subr.mxu0 %v2656_v10  ;;  %v2729_v10 = vld [vmem:[%s4455_s5 + $0x1d0] sm:$0xff] }
 0x1d1   :  { %1176 = vmatpush1.msra.mxu0 %v2655_v11  ;;  %v1339_v11 = vld [vmem:[%s4455_s5 + $0x18] sm:$0xff] }
 0x1d2   :  { %1368 = vmatprep.subr.mxu0 %v1367_v12  ;;  %v2728_v12 = vld [vmem:[%s4455_s5 + $0x1c8] sm:$0xff] }
 0x272   :  { %v3071_v14 = vpop.f32.mrf.mxu0 }
 0x273   :  { %v1085_v15 = vmax.f32 %v3071_v14, 1e-24  ;;  %v2727_v14 = vld [vmem:[%s4455_s5 + $0x1c0] sm:$0xff] }
 0x274   :  { %v1065_v16 = vpop.f32.mrf.mxu0 }
 0x275   :  { %v1084_v17 = vmax.f32 %v1065_v16, 1e-24  ;;  %3148 = vrsqrt.f32 %v1085_v15  ;;  %v1337_v15 = vld [vmem:[%s4455_s5 + $0x8] sm:$0xff]  ;;  %v2726_v16 = vld [vmem:[%s4455_s5 + $0x1b8] sm:$0xff] }
 0x276   :  { %v3074_v18 = vpop.f32.mrf.mxu0 }
 0x277   :  { %3150 = vrsqrt.f32 %v1084_v17  ;;  %v1087_v19 = vmax.f32 %v3074_v18, 1e-24  ;;  %v1336_v17 = vld [vmem:[%s4455_s5] sm:$0xff]  ;;  %v2725_v18 = vld [vmem:[%s4455_s5 + $0x1b0] sm:$0xff] }
 0x278   :  { %v1075_v20 = vpop.f32.mrf.mxu0 }
 0x279   :  { %3152 = vrsqrt.f32 %v1087_v19  ;;  %v1086_v21 = vmax.f32 %v1075_v20, 1e-24  ;;  %v2724_v19 = vld [vmem:[%s4455_s5 + $0x1a8] sm:$0xff]  ;;  %v2723_v20 = vld [vmem:[%s4455_s5 + $0x1a0] sm:$0xff] }
 0x27b   :  { %3154 = vrsqrt.f32 %v1086_v21  ;;  %v2722_v21 = vld [vmem:[%s4455_s5 + $0x198] sm:$0xff] }
 0x282   :  { %v3149_v22 = vpop.eup %3148 }
 0x283   :  { %v1093_v30 = vmul.f32 %v3149_v22, %v3534_v25  ;;  %v1364_v25 = vld [vmem:[%s4455_s5 + $0xe0] sm:$0xff]  ;;  %v2721_v22 = vld [vmem:[%s4455_s5 + $0x190] sm:$0xff] }
 0x284   :  { %v3151_v23 = vpop.eup %3150 }
 0x285   :  { %v1092_v24 = vmul.f32 %v3151_v23, %v3536_v34  ;;  %v1365_v34 = vld [vmem:[%s4455_s5 + $0xe8] sm:$0xff] }
 0x286   :  { %v3153_v29 = vpop.eup %3152  ;;  %v2720_v23 = vld [vmem:[%s4455_s5 + $0x188] sm:$0xff] }
 0x287   :  { %3156 = vtanh.f32 %v1092_v24  ;;  %v1095_v31 = vmul.f32 %v3153_v29, %v3542_v38  ;;  %v2719_v24 = vld [vmem:[%s4455_s5 + $0x180] sm:$0xff]  ;;  %v2718_v29 = vld [vmem:[%s4455_s5 + $0x178] sm:$0xff] }
 0x288   :  { %v3155_v32 = vpop.eup %3154 }
 0x289   :  { %3158 = vtanh.f32 %v1095_v31  ;;  %v1094_v33 = vmul.f32 %v3155_v32, %v3544_v40  ;;  %v1360_v40 = vld [vmem:[%s4455_s5 + $0xc0] sm:$0xff]  ;;  %v2716_v31 = vld [vmem:[%s4455_s5 + $0x168] sm:$0xff] }
 0x28a   :  { %3160 = vtanh.f32 %v1093_v30  ;;  %v2717_v30 = vld [vmem:[%s4455_s5 + $0x170] sm:$0xff]  ;;  %v2715_v32 = vld [vmem:[%s4455_s5 + $0x160] sm:$0xff] }
 0x28b   :  { %3162 = vtanh.f32 %v1094_v33  ;;  %v2714_v33 = vld [vmem:[%s4455_s5 + $0x158] sm:$0xff] }
 0x294   :  { %v3661_v35 = vpop.eup %3156 }
 0x295   :  { %1210 = vmatmul.mubr.f32.vlgmr.msra.gmra.mxu0 %v3661_v35 }
 0x296   :  { %v3670_v36 = vpop.eup %3158  ;;  %1369 = vmatpush1.msra.mxu0 %v1366_v26  ;;  %1215 = vmatprep.mubr.f32.mxu0 %v3248_v7  ;;  %v2713_v26 = vld [vmem:[%s4455_s5 + $0x150] sm:$0xff] }
 0x297   :  { %v3676_v37 = vpop.eup %3160  ;;  %1370 = vmatprep.subr.mxu0 %v1365_v34  ;;  %3075 = vmatprep.subr.mxu1 %v3670_v36  ;;  %v2712_v34 = vld [vmem:[%s4455_s5 + $0x148] sm:$0xff] }
 0x298   :  { %v3682_v38 = vpop.eup %3162  ;;  %1371 = vmatpush1.msra.mxu0 %v1364_v25  ;;  %3076 = vmatpush3.msra.mxu1 %v3670_v36  ;;  %v2711_v25 = vld [vmem:[%s4455_s5 + $0x140] sm:$0xff] }
 0x299   :  { %1372 = vmatprep.subr.mxu0 %v1363_v27  ;;  %1216 = vmatmul.mubr.f32.gmra.mxu0 %v3676_v37  ;;  %v2710_v27 = vld [vmem:[%s4455_s5 + $0x138] sm:$0xff] }
 0x29a   :  { %3077 = vmatprep.subr.mxu1 %v3682_v38  ;;  %1373 = vmatpush1.msra.mxu0 %v1362_v28  ;;  %v2709_v28 = vld [vmem:[%s4455_s5 + $0x130] sm:$0xff] }
 0x29b   :  { %3078 = vmatpush3.msra.mxu1 %v3682_v38  ;;  %1374 = vmatprep.subr.mxu0 %v1361_v39  ;;  %v2708_v39 = vld [vmem:[%s4455_s5 + $0x128] sm:$0xff] }
 0x29c   :  { %3079 = vmatprep.subr.mxu1 %v3676_v37  ;;  %1375 = vmatpush1.msra.mxu0 %v1360_v40  ;;  %v2707_v40 = vld [vmem:[%s4455_s5 + $0x120] sm:$0xff] }
 0x29d   :  { %1221 = vmatprep.mubr.f32.mxu0 %v3248_v7  ;;  %3080 = vmatpush3.msra.mxu1 %v3676_v37 }
 0x29e   :  { %1376 = vmatprep.subr.mxu0 %v1359_v41  ;;  %1222 = vmatmul.mubr.f32.gmra.mxu0 %v3682_v38  ;;  %v2706_v41 = vld [vmem:[%s4455_s5 + $0x118] sm:$0xff] }
 0x29f   :  { %3081 = vmatprep.subr.mxu1 %v3661_v35  ;;  %1377 = vmatpush1.msra.mxu0 %v1358_v42  ;;  %v2705_v42 = vld [vmem:[%s4455_s5 + $0x110] sm:$0xff] }
 0x2a0   :  { %3082 = vmatpush3.msra.mxu1 %v3661_v35  ;;  %1378 = vmatprep.subr.mxu0 %v1357_v43  ;;  %v2704_v43 = vld [vmem:[%s4455_s5 + $0x108] sm:$0xff] }
 0x2a1   :  { %3084 = vmatmul.mubr.msk.f32.vlgmr.msra.gmra.mxu1 %vm160_vm1, %v2688_v44  ;;  %1379 = vmatpush1.msra.mxu0 %v1356_v45  ;;  %v2703_v44 = vld [vmem:[%s4455_s5 + $0x100] sm:$0xff]  ;;  %v2774_v45 = vld [vmem:[%s4455_s5 + $0x2f8] sm:$0xff] }
 0x2a2   :  { %3089 = vmatprep.subr.mxu1 %v3670_v36  ;;  %1227 = vmatprep.mubr.f32.mxu0 %v3248_v7 }
 0x2a3   :  { %1380 = vmatprep.subr.mxu0 %v1355_v46  ;;  %3090 = vmatpush3.msra.mxu1 %v3670_v36 }
 0x2a4   :  { %1228 = vmatmul.mubr.f32.gmra.mxu0 %v3670_v36  ;;  %3091 = vmatprep.subr.mxu1 %v3682_v38 }
 0x2a5   :  { %1381 = vmatpush1.msra.mxu0 %v1354_v47  ;;  %3086 = vmatprep.mubr.msk.f32.mxu1 %vm160_vm1, %v2689_v48 }
 0x2a6   :  { %1382 = vmatprep.subr.mxu0 %v1353_v49  ;;  %3092 = vmatpush3.msra.mxu1 %v3682_v38 }
 0x2a7   :  { %3087 = vmatmul.mubr.msk.f32.gmra.mxu1 %vm160_vm1, %v2690_v50  ;;  %1383 = vmatpush1.msra.mxu0 %v1352_v51 }
 0x2a8   :  { %3093 = vmatprep.subr.mxu1 %v3676_v37  ;;  %1384 = vmatprep.subr.mxu0 %v1351_v52  ;;  %v2735_v52 = vld [vmem:[%s4450_s0 + $0xc0] sm:$0xff] }
 0x2a9   :  { %3094 = vmatpush3.msra.mxu1 %v3676_v37  ;;  %1385 = vmatpush1.msra.mxu0 %v1350_v53  ;;  %v2773_v53 = vld [vmem:[%s4455_s5 + $0x2f0] sm:$0xff] }
 0x2aa   :  { %3095 = vmatprep.subr.mxu1 %v3661_v35  ;;  %1386 = vmatprep.subr.mxu0 %v1349_v54  ;;  %v2772_v54 = vld [vmem:[%s4455_s5 + $0x2e8] sm:$0xff] }
 0x2ab   :  { %3096 = vmatpush3.msra.mxu1 %v3661_v35  ;;  %3097 = vmatprep.mubr.msk.f32.mxu1 %vm160_vm1, %v2695_v55 }
 0x2ac   :  { %1387 = vmatpush1.msra.mxu0 %v1348_v56  ;;  %3098 = vmatmul.mubr.msk.f32.vlgmr.msra.gmra.mxu1 %vm160_vm1, %v2696_v57  ;;  %v2736_v56 = vld [vmem:[%s4450_s0 + $0xc8] sm:$0xff]  ;;  %v2737_v57 = vld [vmem:[%s4450_s0 + $0xd0] sm:$0xff] }
 0x2ad   :  { %1388 = vmatprep.subr.mxu0 %v1347_v58  ;;  %3100 = vmatprep.mubr.msk.f32.mxu1 %vm160_vm1, %v2697_v59  ;;  %v2771_v58 = vld [vmem:[%s4455_s5 + $0x2e0] sm:$0xff] }
 0x2ae   :  { %1389 = vmatpush1.msra.mxu0 %v1346_v60  ;;  %1600 = vmatprep.subr.mxu1 %v2734_v61  ;;  %v2738_v60 = vld [vmem:[%s4450_s0 + $0xd8] sm:$0xff] }
 0x2af   :  { %1390 = vmatprep.subr.mxu0 %v1345_v62  ;;  %1601 = vmatpush1.msra.mxu1 %v2733_v63  ;;  %v2770_v61 = vld [vmem:[%s4455_s5 + $0x2d8] sm:$0xff]  ;;  %v2769_v62 = vld [vmem:[%s4455_s5 + $0x2d0] sm:$0xff]  ;;  %v2768_v63 = vld [vmem:[%s4455_s5 + $0x2c8] sm:$0xff] }
 0x2b0   :  { %1391 = vmatpush1.msra.mxu0 %v1344_v0  ;;  %3101 = vmatmul.mubr.msk.f32.gmra.mxu1 %vm160_vm1, %v2698_v1  ;;  %v2777_v0 = vld [vmem:[%s4450_s0 + $0xf0] sm:$0xff]  ;;  %v2766_v1 = vld [vmem:[%s4455_s5 + $0x2b8] sm:$0xff] }
 0x2b1   :  { %1392 = vmatprep.subr.mxu0 %v1343_v2  ;;  %1602 = vmatprep.subr.mxu1 %v2732_v3  ;;  %v2814_v2 = vld [vmem:[%s4455_s5 + $0x3f8] sm:$0xff]  ;;  %v2765_v3 = vld [vmem:[%s4455_s5 + $0x2b0] sm:$0xff] }
 0x2b2   :  { %1393 = vmatpush1.msra.mxu0 %v1342_v4  ;;  %1603 = vmatpush1.msra.mxu1 %v2731_v5  ;;  %v2778_v4 = vld [vmem:[%s4450_s0 + $0xf8] sm:$0xff]  ;;  %v2764_v5 = vld [vmem:[%s4455_s5 + $0x2a8] sm:$0xff] }
 0x2b3   :  { %1394 = vmatprep.subr.mxu0 %v1341_v6  ;;  %1604 = vmatprep.subr.mxu1 %v2730_v8  ;;  %v2812_v6 = vld [vmem:[%s4455_s5 + $0x3e8] sm:$0xff]  ;;  %v2763_v8 = vld [vmem:[%s4455_s5 + $0x2a0] sm:$0xff] }
 0x2b4   :  { %1395 = vmatpush1.msra.mxu0 %v1340_v9  ;;  %1605 = vmatpush1.msra.mxu1 %v2729_v10  ;;  %v2811_v9 = vld [vmem:[%s4455_s5 + $0x3e0] sm:$0xff]  ;;  %v2762_v10 = vld [vmem:[%s4455_s5 + $0x298] sm:$0xff] }
 0x2b5   :  { %1396 = vmatprep.subr.mxu0 %v1339_v11  ;;  %1606 = vmatprep.subr.mxu1 %v2728_v12  ;;  %v2810_v11 = vld [vmem:[%s4455_s5 + $0x3d8] sm:$0xff]  ;;  %v2761_v12 = vld [vmem:[%s4455_s5 + $0x290] sm:$0xff] }
 0x2b6   :  { %1397 = vmatpush1.msra.mxu0 %v1338_v13  ;;  %1607 = vmatpush1.msra.mxu1 %v2727_v14  ;;  %v2809_v13 = vld [vmem:[%s4455_s5 + $0x3d0] sm:$0xff]  ;;  %v2760_v14 = vld [vmem:[%s4455_s5 + $0x288] sm:$0xff] }
 0x2b7   :  { %1398 = vmatprep.subr.mxu0 %v1337_v15  ;;  %1608 = vmatprep.subr.mxu1 %v2726_v16  ;;  %v2808_v15 = vld [vmem:[%s4455_s5 + $0x3c8] sm:$0xff]  ;;  %v2759_v16 = vld [vmem:[%s4455_s5 + $0x280] sm:$0xff] }
 0x2b8   :  { %1399 = vmatpush1.msra.mxu0 %v1336_v17  ;;  %1609 = vmatpush1.msra.mxu1 %v2725_v18  ;;  %v2807_v17 = vld [vmem:[%s4455_s5 + $0x3c0] sm:$0xff]  ;;  %v2758_v18 = vld [vmem:[%s4455_s5 + $0x278] sm:$0xff] }
 0x2b9   :  { %3103 = vmatprep.subr.mxu0 %v3670_v36  ;;  %1610 = vmatprep.subr.mxu1 %v2724_v19  ;;  %v2806_v19 = vld [vmem:[%s4455_s5 + $0x3b8] sm:$0xff] }
 0x2ba   :  { %1432 = vmatprep.mubr.f32.mxu0 %v3248_v7  ;;  %1664 = vmatprep.mubr.f32.mxu1 %v3248_v7 }
 0x2bb   :  { %1611 = vmatpush1.msra.mxu1 %v2723_v20  ;;  %v2757_v20 = vld [vmem:[%s4455_s5 + $0x270] sm:$0xff] }
 0x2bc   :  { %1612 = vmatprep.subr.mxu1 %v2722_v21  ;;  %v2805_v21 = vld [vmem:[%s4455_s5 + $0x3b0] sm:$0xff] }
 0x2bd   :  { %1613 = vmatpush1.msra.mxu1 %v2721_v22  ;;  %v2756_v22 = vld [vmem:[%s4455_s5 + $0x268] sm:$0xff] }
 0x2be   :  { %1614 = vmatprep.subr.mxu1 %v2720_v23  ;;  %v2804_v23 = vld [vmem:[%s4455_s5 + $0x3a8] sm:$0xff] }
 0x2bf   :  { %1615 = vmatpush1.msra.mxu1 %v2719_v24  ;;  %v2755_v24 = vld [vmem:[%s4455_s5 + $0x260] sm:$0xff] }
 0x2c0   :  { %1616 = vmatprep.subr.mxu1 %v2718_v29  ;;  %v2803_v29 = vld [vmem:[%s4455_s5 + $0x3a0] sm:$0xff] }
 0x2c1   :  { %1617 = vmatpush1.msra.mxu1 %v2717_v30  ;;  %v2754_v30 = vld [vmem:[%s4455_s5 + $0x258] sm:$0xff] }
 0x2c2   :  { %1618 = vmatprep.subr.mxu1 %v2716_v31  ;;  %v2802_v31 = vld [vmem:[%s4455_s5 + $0x398] sm:$0xff] }
 0x2c3   :  { %1619 = vmatpush1.msra.mxu1 %v2715_v32  ;;  %v2753_v32 = vld [vmem:[%s4455_s5 + $0x250] sm:$0xff] }
 0x2c4   :  { %1620 = vmatprep.subr.mxu1 %v2714_v33  ;;  %v2801_v33 = vld [vmem:[%s4455_s5 + $0x390] sm:$0xff] }
 0x2c5   :  { %1621 = vmatpush1.msra.mxu1 %v2713_v26  ;;  %v2752_v26 = vld [vmem:[%s4455_s5 + $0x248] sm:$0xff] }
 0x2c6   :  { %1622 = vmatprep.subr.mxu1 %v2712_v34  ;;  %v2800_v34 = vld [vmem:[%s4455_s5 + $0x388] sm:$0xff] }
 0x2c7   :  { %1623 = vmatpush1.msra.mxu1 %v2711_v25  ;;  %v2751_v25 = vld [vmem:[%s4455_s5 + $0x240] sm:$0xff] }
 0x2c8   :  { %1624 = vmatprep.subr.mxu1 %v2710_v27  ;;  %v2799_v27 = vld [vmem:[%s4455_s5 + $0x380] sm:$0xff] }
 0x2c9   :  { %1625 = vmatpush1.msra.mxu1 %v2709_v28  ;;  %v2750_v28 = vld [vmem:[%s4455_s5 + $0x238] sm:$0xff] }
 0x2ca   :  { %1626 = vmatprep.subr.mxu1 %v2708_v39  ;;  %v2798_v39 = vld [vmem:[%s4455_s5 + $0x378] sm:$0xff] }
 0x2cb   :  { %1627 = vmatpush1.msra.mxu1 %v2707_v40  ;;  %v2749_v40 = vld [vmem:[%s4455_s5 + $0x230] sm:$0xff] }
 0x2cc   :  { %1628 = vmatprep.subr.mxu1 %v2706_v41  ;;  %v2797_v41 = vld [vmem:[%s4455_s5 + $0x370] sm:$0xff] }
 0x2cd   :  { %1629 = vmatpush1.msra.mxu1 %v2705_v42  ;;  %v2748_v42 = vld [vmem:[%s4455_s5 + $0x228] sm:$0xff] }
 0x2ce   :  { %1630 = vmatprep.subr.mxu1 %v2704_v43  ;;  %v2796_v43 = vld [vmem:[%s4455_s5 + $0x368] sm:$0xff] }
 0x2cf   :  { %1631 = vmatpush1.msra.mxu1 %v2703_v44  ;;  %v2747_v44 = vld [vmem:[%s4455_s5 + $0x220] sm:$0xff] }
 0x2d0   :  { %1832 = vmatprep.subr.mxu1 %v2774_v45  ;;  %v2795_v45 = vld [vmem:[%s4455_s5 + $0x360] sm:$0xff] }
 0x361   :  { %v3085_v46 = vpop.f32.mrf.mxu1 }
 0x363   :  { %v1317_v47 = vpop.f32.mrf.mxu1 }
 0x364   :  { %1433 = vmatmul.mubr.f32.vlgmr.msra.gmra.mxu0 %v1317_v47  ;;  %v2794_v47 = vld [vmem:[%s4455_s5 + $0x358] sm:$0xff] }
 0x365   :  { %3104 = vmatpush3.msra.mxu0 %v3670_v36  ;;  %1438 = vmatprep.mubr.f32.mxu0 %v3248_v7 }
 0x366   :  { %3105 = vmatprep.subr.mxu0 %v3682_v38 }
 0x367   :  { %v3088_v48 = vpop.f32.mrf.mxu1  ;;  %3106 = vmatpush3.msra.mxu0 %v3682_v38 }
 0x368   :  { %3107 = vmatprep.subr.mxu0 %v3676_v37  ;;  %1439 = vmatmul.mubr.f32.gmra.mxu0 %v3085_v46  ;;  %v2746_v46 = vld [vmem:[%s4455_s5 + $0x218] sm:$0xff] }
 0x369   :  { %v1327_v49 = vpop.f32.mrf.mxu1  ;;  %3108 = vmatpush3.msra.mxu0 %v3676_v37  ;;  %1444 = vmatprep.mubr.f32.mxu0 %v3248_v7 }
 0x36a   :  { %3109 = vmatprep.subr.mxu0 %v3661_v35 }
 0x36b   :  { %3110 = vmatpush3.msra.mxu0 %v3661_v35 }
 0x36c   :  { %v3099_v50 = vpop.f32.mrf.mxu1  ;;  %3117 = vmatprep.subr.mxu0 %v3670_v36  ;;  %1445 = vmatmul.mubr.f32.gmra.mxu0 %v1327_v49  ;;  %v2793_v49 = vld [vmem:[%s4455_s5 + $0x350] sm:$0xff] }
 0x36d   :  { %1450 = vmatprep.mubr.f32.mxu0 %v3248_v7 }
 0x36e   :  { %v1548_v51 = vpop.f32.mrf.mxu1 }
 0x36f   :  { %1665 = vmatmul.mubr.f32.vlgmr.msra.gmra.mxu1 %v1548_v51  ;;  %v2792_v51 = vld [vmem:[%s4455_s5 + $0x348] sm:$0xff] }
 0x370   :  { %1670 = vmatprep.mubr.f32.mxu1 %v3248_v7  ;;  %1451 = vmatmul.mubr.f32.gmra.mxu0 %v3088_v48  ;;  %v3102_v55 = vpop.f32.mrf.mxu1  ;;  %v2745_v48 = vld [vmem:[%s4455_s5 + $0x210] sm:$0xff] }
 0x371   :  { %3111 = vmatprep.mubr.msk.f32.mxu0 %vm160_vm1, %v2735_v52  ;;  %1833 = vmatpush1.msra.mxu1 %v2773_v53  ;;  %v2743_v52 = vld [vmem:[%s4455_s5 + $0x200] sm:$0xff] }
 0x372   :  { %1834 = vmatprep.subr.mxu1 %v2772_v54  ;;  %v1558_v59 = vpop.f32.mrf.mxu1  ;;  %v2791_v53 = vld [vmem:[%s4455_s5 + $0x340] sm:$0xff]  ;;  %v2790_v54 = vld [vmem:[%s4455_s5 + $0x338] sm:$0xff] }
 0x373   :  { %1671 = vmatmul.mubr.f32.gmra.mxu1 %v3099_v50  ;;  %v2744_v50 = vld [vmem:[%s4455_s5 + $0x208] sm:$0xff] }
 0x374   :  { %1676 = vmatprep.mubr.f32.mxu1 %v3248_v7  ;;  %3112 = vmatmul.mubr.msk.f32.vlgmr.msra.gmra.mxu0 %vm160_vm1, %v2736_v56  ;;  %v2788_v56 = vld [vmem:[%s4455_s5 + $0x328] sm:$0xff] }
 0x375   :  { %3118 = vmatpush3.msra.mxu0 %v3670_v36  ;;  %3114 = vmatprep.mubr.msk.f32.mxu0 %vm160_vm1, %v2737_v57  ;;  %v2775_v36 = vld [vmem:[%s4450_s0 + $0xe0] sm:$0xff] }
 0x376   :  { %3119 = vmatprep.subr.mxu0 %v3682_v38  ;;  %1835 = vmatpush1.msra.mxu1 %v2771_v58  ;;  %v2787_v57 = vld [vmem:[%s4455_s5 + $0x320] sm:$0xff]  ;;  %v2786_v58 = vld [vmem:[%s4455_s5 + $0x318] sm:$0xff] }
 0x377   :  { %1677 = vmatmul.mubr.f32.gmra.mxu1 %v1558_v59  ;;  %3120 = vmatpush3.msra.mxu0 %v3682_v38  ;;  %v2776_v38 = vld [vmem:[%s4450_s0 + $0xe8] sm:$0xff]  ;;  %v2785_v59 = vld [vmem:[%s4455_s5 + $0x310] sm:$0xff] }
 0x378   :  { %1682 = vmatprep.mubr.f32.mxu1 %v3248_v7  ;;  %3121 = vmatprep.subr.mxu0 %v3676_v37 }
 0x379   :  { %3115 = vmatmul.mubr.msk.f32.gmra.mxu0 %vm160_vm1, %v2738_v60  ;;  %1836 = vmatprep.subr.mxu1 %v2770_v61  ;;  %v2784_v60 = vld [vmem:[%s4455_s5 + $0x308] sm:$0xff]  ;;  %v2783_v61 = vld [vmem:[%s4455_s5 + $0x300] sm:$0xff] }
 0x37a   :  { %3122 = vmatpush3.msra.mxu0 %v3676_v37  ;;  %3125 = vmatprep.mubr.msk.f32.mxu0 %vm160_vm1, %v2775_v36  ;;  %v2767_v37 = vld [vmem:[%s4455_s5 + $0x2c0] sm:$0xff]  ;;  %v2200_v36 = vld [vmem:[%s4458_s8 + $0xf8] sm:$0xff] }
 0x37b   :  { %1683 = vmatmul.mubr.f32.gmra.mxu1 %v3102_v55  ;;  %3123 = vmatprep.subr.mxu0 %v3661_v35  ;;  %v2789_v55 = vld [vmem:[%s4455_s5 + $0x330] sm:$0xff] }
 0x37c   :  { %3124 = vmatpush3.msra.mxu0 %v3661_v35  ;;  %1837 = vmatpush1.msra.mxu1 %v2769_v62  ;;  %v2813_v35 = vld [vmem:[%s4455_s5 + $0x3f0] sm:$0xff]  ;;  %v1211_v62 = vpop.f32.mrf.mxu0 }
 0x37d   :  { %3126 = vmatmul.mubr.msk.f32.vlgmr.msra.gmra.mxu0 %vm160_vm1, %v2776_v38  ;;  %1838 = vmatprep.subr.mxu1 %v2768_v63 }
 0x37e   :  { %3128 = vmatprep.mubr.msk.f32.mxu0 %vm160_vm1, %v2777_v0  ;;  %1839 = vmatpush1.msra.mxu1 %v2767_v37  ;;  %v1213_v38 = vpop.f32.mrf.mxu0  ;;  %v1135_v37 = vlaneseq }
 0x37f   :  { %1840 = vmatprep.subr.mxu1 %v2766_v1  ;;  %2064 = vmatprep.subr.mxu0 %v2814_v2 }
 0x380   :  { %1841 = vmatpush1.msra.mxu1 %v2765_v3  ;;  %2065 = vmatpush1.msra.mxu0 %v2813_v35  ;;  %v1217_v63 = vpop.f32.mrf.mxu0  ;;  %v1136_v2 = vshrl.u32 %v1135_v37, 7  ;;  %v2177_v37 = vld [vmem:[%s4458_s8 + $0x40] sm:$0xff] }
 0x381   :  { %3129 = vmatmul.mubr.msk.f32.gmra.mxu0 %vm160_vm1, %v2778_v4  ;;  %1842 = vmatprep.subr.mxu1 %v2764_v5  ;;  %v1133_v4 = vld [vmem:[%s4456_s6] sm:$0x3] }
 0x382   :  { %2066 = vmatprep.subr.mxu0 %v2812_v6  ;;  %1843 = vmatpush1.msra.mxu1 %v2763_v8  ;;  %v1219_v0 = vpop.f32.mrf.mxu0  ;;  %v4159_v35 = vsub.s32 0, %v1136_v2  ;;  %v4164_v5 = vsub.s32 1, %v1136_v2  ;;  %v2175_v2 = vld [vmem:[%s4458_s8 + $0x30] sm:$0xff] }
 0x383   :  { %2067 = vmatpush1.msra.mxu0 %v2811_v9  ;;  %1844 = vmatprep.subr.mxu1 %v2762_v10 }
 0x384   :  { %2068 = vmatprep.subr.mxu0 %v2810_v11  ;;  %1896 = vmatprep.mubr.f32.mxu1 %v3248_v7  ;;  %v1223_v1 = vpop.f32.mrf.mxu0  ;;  %v1138_v8 = vrot.slane %v1133_v4, %v4159_v35  ;;  %v4168_v9 = vrot.slane %v1133_v4, %v4164_v5  ;;  %v2173_v4 = vld [vmem:[%s4458_s8 + $0x20] sm:$0xff] }
 0x385   :  { %2128 = vmatprep.mubr.f32.mxu0 %v3248_v7  ;;  %1845 = vmatpush1.msra.mxu1 %v2761_v12 }
 0x386   :  { %2069 = vmatpush1.msra.mxu0 %v2809_v13  ;;  %1846 = vmatprep.subr.mxu1 %v2760_v14  ;;  %v1225_v3 = vpop.f32.mrf.mxu0  ;;  %v1212_v11 = vadd.f32 %v1211_v62, %v1138_v8  ;;  %v1214_v13 = vadd.f32 %v1213_v38, %v4168_v9  ;;  %v2181_v62 = vld [vmem:[%s4458_s8 + $0x60] sm:$0xff]  ;;  %v2180_v38 = vld [vmem:[%s4458_s8 + $0x58] sm:$0xff] }
 0x387   :  { %2070 = vmatprep.subr.mxu0 %v2808_v15  ;;  %1847 = vmatpush1.msra.mxu1 %v2759_v16  ;;  %v1218_v16 = vadd.f32 %v1217_v63, %v1138_v8  ;;  %v2179_v63 = vld [vmem:[%s4458_s8 + $0x50] sm:$0xff] }
 0x388   :  { %2071 = vmatpush1.msra.mxu0 %v2807_v17  ;;  %1848 = vmatprep.subr.mxu1 %v2758_v18  ;;  %v1229_v6 = vpop.f32.mrf.mxu0 }
 0x389   :  { %2072 = vmatprep.subr.mxu0 %v2806_v19  ;;  %1849 = vmatpush1.msra.mxu1 %v2757_v20  ;;  %v1220_v19 = vadd.f32 %v1219_v0, %v4168_v9  ;;  %v2178_v0 = vld [vmem:[%s4458_s8 + $0x48] sm:$0xff] }
 0x38a   :  { %2073 = vmatpush1.msra.mxu0 %v2805_v21  ;;  %1850 = vmatprep.subr.mxu1 %v2756_v22  ;;  %v4170_v10 = vpop.f32.mrf.mxu0  ;;  %v1224_v22 = vadd.f32 %v1223_v1, %v1138_v8  ;;  %v2176_v1 = vld [vmem:[%s4458_s8 + $0x38] sm:$0xff] }
 0x38b   :  { %2074 = vmatprep.subr.mxu0 %v2804_v23  ;;  %1851 = vmatpush1.msra.mxu1 %v2755_v24 }
 0x38c   :  { %2075 = vmatpush1.msra.mxu0 %v2803_v29  ;;  %1852 = vmatprep.subr.mxu1 %v2754_v30  ;;  %v1226_v29 = vadd.f32 %v1225_v3, %v4168_v9  ;;  %v2174_v3 = vld [vmem:[%s4458_s8 + $0x28] sm:$0xff] }
 0x38d   :  { %2076 = vmatprep.subr.mxu0 %v2802_v31  ;;  %1853 = vmatpush1.msra.mxu1 %v2753_v32  ;;  %v1230_v32 = vadd.f32 %v1229_v6, %v1138_v8  ;;  %v2172_v6 = vld [vmem:[%s4458_s8 + $0x18] sm:$0xff]  ;;  %v2171_v8 = vld [vmem:[%s4458_s8 + $0x10] sm:$0xff] }
 0x38e   :  { %2077 = vmatpush1.msra.mxu0 %v2801_v33  ;;  %1854 = vmatprep.subr.mxu1 %v2752_v26 }
 0x38f   :  { %2078 = vmatprep.subr.mxu0 %v2800_v34  ;;  %1855 = vmatpush1.msra.mxu1 %v2751_v25 }
 0x390   :  { %2079 = vmatpush1.msra.mxu0 %v2799_v27  ;;  %1856 = vmatprep.subr.mxu1 %v2750_v28  ;;  %v2199_v28 = vld [vmem:[%s4458_s8 + $0xf0] sm:$0xff] }
 0x391   :  { %2080 = vmatprep.subr.mxu0 %v2798_v39  ;;  %1857 = vmatpush1.msra.mxu1 %v2749_v40  ;;  %v2198_v40 = vld [vmem:[%s4458_s8 + $0xe8] sm:$0xff] }
 0x392   :  { %2081 = vmatpush1.msra.mxu0 %v2797_v41  ;;  %1858 = vmatprep.subr.mxu1 %v2748_v42  ;;  %v2197_v41 = vld [vmem:[%s4458_s8 + $0xe0] sm:$0xff]  ;;  %v2196_v42 = vld [vmem:[%s4458_s8 + $0xd8] sm:$0xff] }
 0x393   :  { %2082 = vmatprep.subr.mxu0 %v2796_v43  ;;  %1859 = vmatpush1.msra.mxu1 %v2747_v44  ;;  %v2195_v44 = vld [vmem:[%s4458_s8 + $0xd0] sm:$0xff] }
 0x394   :  { %2083 = vmatpush1.msra.mxu0 %v2795_v45  ;;  %1860 = vmatprep.subr.mxu1 %v2746_v46  ;;  %v2194_v45 = vld [vmem:[%s4458_s8 + $0xc8] sm:$0xff] }
 0x395   :  { %2084 = vmatprep.subr.mxu0 %v2794_v47  ;;  %1861 = vmatpush1.msra.mxu1 %v2745_v48  ;;  %v2193_v47 = vld [vmem:[%s4458_s8 + $0xc0] sm:$0xff]  ;;  %v2192_v48 = vld [vmem:[%s4458_s8 + $0xb8] sm:$0xff] }
 0x396   :  { %2085 = vmatpush1.msra.mxu0 %v2793_v49  ;;  %1862 = vmatprep.subr.mxu1 %v2744_v50  ;;  %v2191_v50 = vld [vmem:[%s4458_s8 + $0xb0] sm:$0xff] }
 0x397   :  { %2086 = vmatprep.subr.mxu0 %v2792_v51  ;;  %1863 = vmatpush1.msra.mxu1 %v2743_v52  ;;  %v2190_v52 = vld [vmem:[%s4458_s8 + $0xa8] sm:$0xff] }
 0x398   :  { %2087 = vmatpush1.msra.mxu0 %v2791_v53  ;;  %2233 = vmatprep.subr.mxu1 %v2200_v36  ;;  %v2189_v53 = vld [vmem:[%s4458_s8 + $0xa0] sm:$0xff]  ;;  %v2182_v36 = vld [vmem:[%s4458_s8 + $0x68] sm:$0xff] }
 0x399   :  { %2088 = vmatprep.subr.mxu0 %v2790_v54  ;;  %v2188_v54 = vld [vmem:[%s4458_s8 + $0x98] sm:$0xff] }
 0x39a   :  { %2089 = vmatpush1.msra.mxu0 %v2789_v55 }
 0x39b   :  { %2090 = vmatprep.subr.mxu0 %v2788_v56  ;;  %v2187_v56 = vld [vmem:[%s4458_s8 + $0x90] sm:$0xff] }
 0x39c   :  { %2091 = vmatpush1.msra.mxu0 %v2787_v57  ;;  %v2186_v57 = vld [vmem:[%s4458_s8 + $0x88] sm:$0xff] }
 0x39d   :  { %2092 = vmatprep.subr.mxu0 %v2786_v58  ;;  %v2185_v58 = vld [vmem:[%s4458_s8 + $0x80] sm:$0xff] }
 0x39e   :  { %2093 = vmatpush1.msra.mxu0 %v2785_v59  ;;  %v2184_v59 = vld [vmem:[%s4458_s8 + $0x78] sm:$0xff] }
 0x39f   :  { %2094 = vmatprep.subr.mxu0 %v2784_v60 }
 0x3a0   :  { %2095 = vmatpush1.msra.mxu0 %v2783_v61  ;;  %v2183_v61 = vld [vmem:[%s4458_s8 + $0x70] sm:$0xff] }
 0x424   :  { %v1434_v12 = vpop.f32.mrf.mxu0 }
 0x425   :  { %v4173_v14 = vadd.f32 %v1434_v12, %v1212_v11  ;;  %v2170_v11 = vld [vmem:[%s4458_s8 + $0x8] sm:$0xff]  ;;  %v2169_v12 = vld [vmem:[%s4458_s8] sm:$0xff] }
 0x426   :  { %v1436_v15 = vpop.f32.mrf.mxu0 }
 0x427   :  { %v4175_v17 = vadd.f32 %v1436_v15, %v1214_v13  ;;  %v2232_v13 = vld [vmem:[%s4458_s8 + $0x1f8] sm:$0xff]  ;;  %v2231_v15 = vld [vmem:[%s4458_s8 + $0x1f0] sm:$0xff] }
 0x428   :  { %v1440_v18 = vpop.f32.mrf.mxu0 }
 0x429   :  { %v4178_v20 = vadd.f32 %v1440_v18, %v1218_v16  ;;  %v2230_v16 = vld [vmem:[%s4458_s8 + $0x1e8] sm:$0xff]  ;;  %v2229_v18 = vld [vmem:[%s4458_s8 + $0x1e0] sm:$0xff] }
 0x42a   :  { %v1442_v21 = vpop.f32.mrf.mxu0 }
 0x42b   :  { %v4180_v23 = vadd.f32 %v1442_v21, %v1220_v19  ;;  %v2228_v19 = vld [vmem:[%s4458_s8 + $0x1d8] sm:$0xff]  ;;  %v2227_v21 = vld [vmem:[%s4458_s8 + $0x1d0] sm:$0xff] }
 0x42c   :  { %v1446_v24 = vpop.f32.mrf.mxu0 }
 0x42d   :  { %v4183_v30 = vadd.f32 %v1446_v24, %v1224_v22  ;;  %v2226_v22 = vld [vmem:[%s4458_s8 + $0x1c8] sm:$0xff]  ;;  %v2225_v24 = vld [vmem:[%s4458_s8 + $0x1c0] sm:$0xff] }
 0x42e   :  { %v1448_v31 = vpop.f32.mrf.mxu0 }
 0x42f   :  { %v4185_v33 = vadd.f32 %v1448_v31, %v1226_v29  ;;  %v2224_v29 = vld [vmem:[%s4458_s8 + $0x1b8] sm:$0xff]  ;;  %v2223_v31 = vld [vmem:[%s4458_s8 + $0x1b0] sm:$0xff] }
 0x430   :  { %v1452_v26 = vpop.f32.mrf.mxu0 }
 0x431   :  { %v4187_v34 = vadd.f32 %v1452_v26, %v1230_v32  ;;  %v2222_v32 = vld [vmem:[%s4458_s8 + $0x1a8] sm:$0xff]  ;;  %v2221_v26 = vld [vmem:[%s4458_s8 + $0x1a0] sm:$0xff] }
 0x432   :  { %v4189_v25 = vpop.f32.mrf.mxu0 }
 0x434   :  { %v3113_v27 = vpop.f32.mrf.mxu0 }
 0x436   :  { %v1780_v39 = vpop.f32.mrf.mxu0 }
 0x437   :  { %1897 = vmatmul.mubr.f32.vlgmr.msra.gmra.mxu1 %v1780_v39  ;;  %v2218_v39 = vld [vmem:[%s4458_s8 + $0x188] sm:$0xff] }
 0x438   :  { %1902 = vmatprep.mubr.f32.mxu1 %v3248_v7  ;;  %2234 = vmatpush1.msra.mxu1 %v2199_v28  ;;  %v2219_v28 = vld [vmem:[%s4458_s8 + $0x190] sm:$0xff] }
 0x439   :  { %v3116_v43 = vpop.f32.mrf.mxu0  ;;  %2235 = vmatprep.subr.mxu1 %v2198_v40  ;;  %v2217_v40 = vld [vmem:[%s4458_s8 + $0x180] sm:$0xff] }
 0x43a   :  { %2236 = vmatpush1.msra.mxu1 %v2197_v41  ;;  %v2216_v41 = vld [vmem:[%s4458_s8 + $0x178] sm:$0xff] }
 0x43b   :  { %v1790_v46 = vpop.f32.mrf.mxu0  ;;  %1903 = vmatmul.mubr.f32.gmra.mxu1 %v3113_v27  ;;  %2237 = vmatprep.subr.mxu1 %v2196_v42  ;;  %v2220_v27 = vld [vmem:[%s4458_s8 + $0x198] sm:$0xff]  ;;  %v2215_v42 = vld [vmem:[%s4458_s8 + $0x170] sm:$0xff] }
 0x43c   :  { %1908 = vmatprep.mubr.f32.mxu1 %v3248_v7  ;;  %2238 = vmatpush1.msra.mxu1 %v2195_v44  ;;  %v2213_v44 = vld [vmem:[%s4458_s8 + $0x160] sm:$0xff] }
 0x43d   :  { %v3127_v49 = vpop.f32.mrf.mxu0  ;;  %2239 = vmatprep.subr.mxu1 %v2194_v45  ;;  %v2212_v45 = vld [vmem:[%s4458_s8 + $0x158] sm:$0xff] }
 0x43e   :  { %2240 = vmatpush1.msra.mxu1 %v2193_v47  ;;  %v2210_v47 = vld [vmem:[%s4458_s8 + $0x148] sm:$0xff] }
 0x43f   :  { %v2012_v51 = vpop.f32.mrf.mxu0  ;;  %1909 = vmatmul.mubr.f32.gmra.mxu1 %v1790_v46  ;;  %2241 = vmatprep.subr.mxu1 %v2192_v48  ;;  %v2211_v46 = vld [vmem:[%s4458_s8 + $0x150] sm:$0xff]  ;;  %v2209_v48 = vld [vmem:[%s4458_s8 + $0x140] sm:$0xff] }
 0x440   :  { %2129 = vmatmul.mubr.f32.vlgmr.msra.gmra.mxu0 %v2012_v51  ;;  %1914 = vmatprep.mubr.f32.mxu1 %v3248_v7  ;;  %v2206_v51 = vld [vmem:[%s4458_s8 + $0x128] sm:$0xff] }
 0x441   :  { %2134 = vmatprep.mubr.f32.mxu0 %v3248_v7  ;;  %2242 = vmatpush1.msra.mxu1 %v2191_v50  ;;  %v3130_v55 = vpop.f32.mrf.mxu0  ;;  %v2207_v50 = vld [vmem:[%s4458_s8 + $0x130] sm:$0xff] }
 0x442   :  { %2243 = vmatprep.subr.mxu1 %v2190_v52  ;;  %v2205_v52 = vld [vmem:[%s4458_s8 + $0x120] sm:$0xff] }
 0x443   :  { %1915 = vmatmul.mubr.f32.gmra.mxu1 %v3116_v43  ;;  %v2022_v60 = vpop.f32.mrf.mxu0  ;;  %v2214_v43 = vld [vmem:[%s4458_s8 + $0x168] sm:$0xff] }
 0x444   :  { %2135 = vmatmul.mubr.f32.gmra.mxu0 %v3127_v49  ;;  %2244 = vmatpush1.msra.mxu1 %v2189_v53  ;;  %v2208_v49 = vld [vmem:[%s4458_s8 + $0x138] sm:$0xff] }
 0x445   :  { %2140 = vmatprep.mubr.f32.mxu0 %v3248_v7  ;;  %2245 = vmatprep.subr.mxu1 %v2188_v54  ;;  %v2204_v53 = vld [vmem:[%s4458_s8 + $0x118] sm:$0xff]  ;;  %v2203_v54 = vld [vmem:[%s4458_s8 + $0x110] sm:$0xff] }
 0x446   :  { %2246 = vmatpush1.msra.mxu1 %v2187_v56  ;;  %v2201_v56 = vld [vmem:[%s4458_s8 + $0x100] sm:$0xff] }
 0x447   :  { %2247 = vmatprep.subr.mxu1 %v2186_v57  ;;  %v1666_v57 = vpop.f32.mrf.mxu1 }
 0x448   :  { %2141 = vmatmul.mubr.f32.gmra.mxu0 %v2022_v60  ;;  %2248 = vmatpush1.msra.mxu1 %v2185_v58 }
 0x449   :  { %2146 = vmatprep.mubr.f32.mxu0 %v3248_v7  ;;  %2249 = vmatprep.subr.mxu1 %v2184_v59  ;;  %v1668_v58 = vpop.f32.mrf.mxu1 }
 0x44a   :  { %2250 = vmatpush1.msra.mxu1 %v2183_v61 }
 0x44b   :  { %2251 = vmatprep.subr.mxu1 %v2182_v36  ;;  %v1672_v59 = vpop.f32.mrf.mxu1 }
 0x44c   :  { %2147 = vmatmul.mubr.f32.gmra.mxu0 %v3130_v55  ;;  %2252 = vmatpush1.msra.mxu1 %v2181_v62  ;;  %v2202_v55 = vld [vmem:[%s4458_s8 + $0x108] sm:$0xff] }
 0x44d   :  { %2253 = vmatprep.subr.mxu1 %v2180_v38  ;;  %2434 = vmatprep.mubr.f32.mxu0 %v3248_v7  ;;  %v1674_v60 = vpop.f32.mrf.mxu1 }
 0x44e   :  { %2254 = vmatpush1.msra.mxu1 %v2179_v63 }
 0x44f   :  { %2255 = vmatprep.subr.mxu1 %v2178_v0  ;;  %v1678_v61 = vpop.f32.mrf.mxu1 }
 0x450   :  { %2256 = vmatpush1.msra.mxu1 %v2177_v37 }
 0x451   :  { %2257 = vmatprep.subr.mxu1 %v2176_v1  ;;  %v1680_v36 = vpop.f32.mrf.mxu1 }
 0x452   :  { %2258 = vmatpush1.msra.mxu1 %v2175_v2  ;;  %v1689_v2 = vadd.f32 %v1666_v57, %v4173_v14 }
 0x453   :  { %2259 = vmatprep.subr.mxu1 %v2174_v3  ;;  %v1684_v62 = vpop.f32.mrf.mxu1  ;;  %v1690_v3 = vadd.f32 %v1668_v58, %v4175_v17  ;;  %v1693_v17 = vadd.f32 %v1678_v61, %v4183_v30 }
 0x454   :  { %2260 = vmatpush1.msra.mxu1 %v2173_v4 }
 0x455   :  { %2261 = vmatprep.subr.mxu1 %v2172_v6  ;;  %v1686_v38 = vpop.f32.mrf.mxu1 }
 0x456   :  { %2262 = vmatpush1.msra.mxu1 %v2171_v8 }
 0x457   :  { %2263 = vmatprep.subr.mxu1 %v2170_v11 }
 0x458   :  { %2264 = vmatpush1.msra.mxu1 %v2169_v12  ;;  %v1691_v12 = vadd.f32 %v1672_v59, %v4178_v20 }
 0x459   :  { %2265 = vmatprep.subr.mxu1 %v2232_v13 }
 0x45a   :  { %2266 = vmatpush2.msra.mxu1 %v2231_v15 }
 0x45b   :  { %2267 = vmatprep.subr.mxu1 %v2230_v16 }
 0x45c   :  { %2268 = vmatpush2.msra.mxu1 %v2229_v18  ;;  %v1692_v18 = vadd.f32 %v1674_v60, %v4180_v23  ;;  %v1232_v23 = vadd.f32 %v4170_v10, %v4168_v9 }
 0x45d   :  { %2269 = vmatprep.subr.mxu1 %v2228_v19 }
 0x45e   :  { %2270 = vmatpush2.msra.mxu1 %v2227_v21  ;;  %v1464_v30 = vadd.f32 %v4189_v25, %v1232_v23 }
 0x45f   :  { %2271 = vmatprep.subr.mxu1 %v2226_v22 }
 0x460   :  { %2272 = vmatpush2.msra.mxu1 %v2225_v24 }
 0x461   :  { %2273 = vmatprep.subr.mxu1 %v2224_v29 }
 0x462   :  { %2274 = vmatpush2.msra.mxu1 %v2223_v31 }
 0x463   :  { %2275 = vmatprep.subr.mxu1 %v2222_v32 }
 0x464   :  { %2276 = vmatpush2.msra.mxu1 %v2221_v26  ;;  %v1694_v26 = vadd.f32 %v1680_v36, %v4185_v33 }
 0x465   :  { %2277 = vmatprep.subr.mxu1 %v2220_v27 }
 0x466   :  { %2278 = vmatpush2.msra.mxu1 %v2219_v28 }
 0x467   :  { %2279 = vmatprep.subr.mxu1 %v2218_v39 }
 0x468   :  { %2280 = vmatpush2.msra.mxu1 %v2217_v40 }
 0x469   :  { %2281 = vmatprep.subr.mxu1 %v2216_v41 }
 0x46a   :  { %2282 = vmatpush2.msra.mxu1 %v2215_v42  ;;  %v1695_v42 = vadd.f32 %v1684_v62, %v4187_v34 }
 0x46b   :  { %2283 = vmatprep.subr.mxu1 %v2214_v43 }
 0x46c   :  { %2284 = vmatpush2.msra.mxu1 %v2213_v44  ;;  %v1696_v44 = vadd.f32 %v1686_v38, %v1464_v30  ;;  %v4429_v30 = vld [vmem:[%s4460_s10] sm:$0x3] }
 0x46d   :  { %2285 = vmatprep.subr.mxu1 %v2212_v45 }
 0x46e   :  { %2286 = vmatpush2.msra.mxu1 %v2211_v46 }
 0x46f   :  { %2287 = vmatprep.subr.mxu1 %v2210_v47 }
 0x470   :  { %2288 = vmatpush2.msra.mxu1 %v2209_v48 }
 0x471   :  { %2289 = vmatprep.subr.mxu1 %v2208_v49 }
 0x472   :  { %2290 = vmatpush2.msra.mxu1 %v2207_v50 }
 0x473   :  { %2291 = vmatprep.subr.mxu1 %v2206_v51 }
 0x474   :  { %2292 = vmatpush2.msra.mxu1 %v2205_v52 }
 0x475   :  { %2293 = vmatprep.subr.mxu1 %v2204_v53 }
 0x476   :  { %2294 = vmatpush2.msra.mxu1 %v2203_v54 }
 0x477   :  { %2295 = vmatprep.subr.mxu1 %v2202_v55 }
 0x478   :  { %2296 = vmatpush2.msra.mxu1 %v2201_v56 }
 0x4f7   :  { %v1898_v63 = vpop.f32.mrf.mxu1 }
 0x4f8   :  { %v1921_v6 = vadd.f32 %v1898_v63, %v1689_v2 }
 0x4f9   :  { %v1900_v0 = vpop.f32.mrf.mxu1 }
 0x4fa   :  { %v1922_v11 = vadd.f32 %v1900_v0, %v1690_v3 }
 0x4fb   :  { %v1904_v37 = vpop.f32.mrf.mxu1 }
 0x4fc   :  { %v1923_v21 = vadd.f32 %v1904_v37, %v1691_v12 }
 0x4fd   :  { %v1906_v1 = vpop.f32.mrf.mxu1 }
 0x4fe   :  { %v1924_v24 = vadd.f32 %v1906_v1, %v1692_v18 }
 0x4ff   :  { %v1910_v4 = vpop.f32.mrf.mxu1 }
 0x500   :  { %v2130_v8 = vpop.f32.mrf.mxu0  ;;  %v1925_v28 = vadd.f32 %v1910_v4, %v1693_v17 }
 0x501   :  { %v4390_v13 = vadd.f32 %v2130_v8, %v1921_v6  ;;  %v1912_v15 = vpop.f32.mrf.mxu1 }
 0x502   :  { %v2132_v16 = vpop.f32.mrf.mxu0  ;;  %v1926_v40 = vadd.f32 %v1912_v15, %v1694_v26 }
 0x503   :  { %v4393_v19 = vadd.f32 %v2132_v16, %v1922_v11  ;;  %v2161_v29 = vmul.f32 %v4390_v13, %v4390_v13  ;;  %v1916_v20 = vpop.f32.mrf.mxu1 }
 0x504   :  { %v2136_v22 = vpop.f32.mrf.mxu0  ;;  %v1927_v46 = vadd.f32 %v1916_v20, %v1695_v42 }
 0x505   :  { %v2162_v14 = vmul.f32 %v4393_v19, %v4393_v19  ;;  %v4400_v31 = vadd.f32 %v2136_v22, %v1923_v21  ;;  %v1918_v9 = vpop.f32.mrf.mxu1 }
 0x506   :  { %v2138_v32 = vpop.f32.mrf.mxu0  ;;  %v1928_v48 = vadd.f32 %v1918_v9, %v1696_v44 }
 0x507   :  { %v4405_v27 = vadd.f32 %v2138_v32, %v1924_v24  ;;  %2297 = vmatprep.mubr.f32.mxu1 %v2162_v14  ;;  %v2163_v43 = vmul.f32 %v4400_v31, %v4400_v31 }
 0x508   :  { %v2142_v39 = vpop.f32.mrf.mxu0  ;;  %2298 = vmatmul.mubr.f32.vlgmr.msra.gmra.mxu1 %v2161_v29 }
 0x509   :  { %v2164_v41 = vmul.f32 %v4405_v27, %v4405_v27  ;;  %v2157_v10 = vadd.f32 %v2142_v39, %v1925_v28  ;;  %v2362_v28 = vld [vmem:[%s4459_s9] sm:$0xff]  ;;  %v2363_v39 = vld [vmem:[%s4459_s9 + $0x8] sm:$0xff] }
 0x50a   :  { %v2144_v33 = vpop.f32.mrf.mxu0 }
 0x50b   :  { %v2158_v45 = vadd.f32 %v2144_v33, %v1926_v40  ;;  %2303 = vmatprep.mubr.f32.mxu1 %v2164_v41  ;;  %v2165_v49 = vmul.f32 %v2157_v10, %v2157_v10  ;;  %v2452_v40 = vrot.slane %v4429_v30, %v4159_v35  ;;  %v2456_v41 = vrot.slane %v4429_v30, %v4164_v5 }
 0x50c   :  { %v2148_v47 = vpop.f32.mrf.mxu0  ;;  %2304 = vmatmul.mubr.f32.gmra.mxu1 %v2163_v43 }
 0x50d   :  { %v2166_v25 = vmul.f32 %v2158_v45, %v2158_v45  ;;  %v2159_v50 = vadd.f32 %v2148_v47, %v1927_v46 }
 0x50e   :  { %v2150_v51 = vpop.f32.mrf.mxu0 }
 0x50f   :  { %v2160_v52 = vadd.f32 %v2150_v51, %v1928_v48  ;;  %2309 = vmatprep.mubr.f32.mxu1 %v2166_v25  ;;  %v2167_v53 = vmul.f32 %v2159_v50, %v2159_v50 }
 0x510   :  { %2310 = vmatmul.mubr.f32.gmra.mxu1 %v2165_v49 }
 0x511   :  { %v2168_v34 = vmul.f32 %v2160_v52, %v2160_v52 }
 0x513   :  { %2315 = vmatprep.mubr.f32.mxu1 %v2168_v34 }
 0x514   :  { %2316 = vmatmul.mubr.f32.gmra.mxu1 %v2167_v53 }
 0x515   :  { %2440 = vmatprep.mubr.f32.mxu1 %v3248_v7 }
 0x5c8   :  { %v2299_v54 = vpop.f32.mrf.mxu1 }
 0x5c9   :  { %v2322_v55 = vmax.f32 %v2299_v54, 1e-24 }
 0x5ca   :  { %v2301_v56 = vpop.f32.mrf.mxu1 }
 0x5cb   :  { %3164 = vrsqrt.f32 %v2322_v55  ;;  %v2323_v57 = vmax.f32 %v2301_v56, 1e-24 }
 0x5cc   :  { %v2305_v58 = vpop.f32.mrf.mxu1 }
 0x5cd   :  { %3166 = vrsqrt.f32 %v2323_v57  ;;  %v2324_v59 = vmax.f32 %v2305_v58, 1e-24 }
 0x5ce   :  { %v2307_v60 = vpop.f32.mrf.mxu1 }
 0x5cf   :  { %3168 = vrsqrt.f32 %v2324_v59  ;;  %v2325_v61 = vmax.f32 %v2307_v60, 1e-24 }
 0x5d0   :  { %v2311_v36 = vpop.f32.mrf.mxu1 }
 0x5d1   :  { %3170 = vrsqrt.f32 %v2325_v61  ;;  %v2326_v62 = vmax.f32 %v2311_v36, 1e-24 }
 0x5d2   :  { %v2313_v38 = vpop.f32.mrf.mxu1 }
 0x5d3   :  { %3172 = vrsqrt.f32 %v2326_v62  ;;  %v2327_v63 = vmax.f32 %v2313_v38, 1e-24 }
 0x5d4   :  { %v2317_v0 = vpop.f32.mrf.mxu1 }
 0x5d5   :  { %3174 = vrsqrt.f32 %v2327_v63  ;;  %v2328_v7 = vmax.f32 %v2317_v0, 1e-24 }
 0x5d6   :  { %v2319_v37 = vpop.f32.mrf.mxu1 }
 0x5d7   :  { %3176 = vrsqrt.f32 %v2328_v7  ;;  %v2329_v1 = vmax.f32 %v2319_v37, 1e-24 }
 0x5d8   :  { %v3165_v2 = vpop.eup %3164 }
 0x5d9   :  { %v2338_v3 = vmul.f32 %v3165_v2, %v4390_v13  ;;  %3178 = vrsqrt.f32 %v2329_v1  ;;  %v2469_v1 = vld [vmem:[%s4461_s11] sm:$0xff] }
 0x5da   :  { %v3167_v4 = vpop.eup %3166 }
 0x5db   :  { %3180 = vtanh.f32 %v2338_v3  ;;  %v2339_v6 = vmul.f32 %v3167_v4, %v4393_v19 }
 0x5dc   :  { %v3169_v8 = vpop.eup %3168 }
 0x5dd   :  { %3182 = vtanh.f32 %v2339_v6  ;;  %v2340_v11 = vmul.f32 %v3169_v8, %v4400_v31 }
 0x5de   :  { %v3171_v12 = vpop.eup %3170 }
 0x5df   :  { %3184 = vtanh.f32 %v2340_v11  ;;  %v2341_v15 = vmul.f32 %v3171_v12, %v4405_v27 }
 0x5e0   :  { %v3173_v16 = vpop.eup %3172 }
 0x5e1   :  { %3186 = vtanh.f32 %v2341_v15  ;;  %v2342_v18 = vmul.f32 %v3173_v16, %v2157_v10  ;;  %v2470_v15 = vld [vmem:[%s4461_s11 + $0x8] sm:$0xff]  ;;  %v2513_v16 = vsub.f32 1.0, %v2469_v1  ;;  %s3249_s11 = smov [#allocation2]  }
 0x5e2   :  { %v3175_v21 = vpop.eup %3174  ;;  %s2575_s25 = sshll.u32 %s3249_s11, 4  ;;  %s2576_s25 = int_to_ptr.vmem [resolvable:$true] %s2575_s25 }
 0x5e3   :  { %3188 = vtanh.f32 %v2342_v18  ;;  %v2343_v22 = vmul.f32 %v3175_v21, %v2158_v45  ;;  %s3204_s26 = scalar_lea.vmem %s2576_s25, 1024  ;;  %p3209_p1 = scmp.lt.s32.totalorder %s2576_s25, %s2576_s25 }
 0x5e4   :  { %v3177_v13 = vpop.eup %3176  ;;  %p3205_p0 = scmp.ne.s32.totalorder %s2576_s25, %s3204_s26  ;;  %p3210_p2 = scmp.lt.s32.totalorder %s3204_s26, %s3204_s26 }
 0x5e5   :  { %3190 = vtanh.f32 %v2343_v22  ;;  %v2344_v24 = vmul.f32 %v3177_v13, %v2159_v50 }
 0x5e6   :  { %v3179_v14 = vpop.eup %3178  ;;  %p3211_p3 = por %p3210_p2, %p3209_p1 }
 0x5e7   :  { %3192 = vtanh.f32 %v2344_v24  ;;  %v2345_v19 = vmul.f32 %v3179_v14, %v2160_v52 }
 0x5e8   :  { %v3181_v17 = vpop.eup %3180  ;;  %p3212_p4 = pnand %p3211_p3, %p3205_p0 }
 0x5e9   :  { %2354 = vst [vmem:[#allocation2] sm:$0xff] %v3181_v17  ;;  %3194 = vtanh.f32 %v2345_v19 }
 0x5ea   :  { %v3183_v29 = vpop.eup %3182 }
 0x5eb   :  { %2355 = vst [vmem:[#allocation2 + $0x8] sm:$0xff] %v3183_v29 }
 0x5ec   :  { %v3185_v20 = vpop.eup %3184 }
 0x5ed   :  { %2356 = vst [vmem:[#allocation2 + $0x10] sm:$0xff] %v3185_v20 }
 0x5ee   :  { %v3187_v31 = vpop.eup %3186 }
 0x5ef   :  { %2357 = vst [vmem:[#allocation2 + $0x18] sm:$0xff] %v3187_v31 }
 0x5f0   :  { %v3189_v32 = vpop.eup %3188 }
 0x5f1   :  { %2358 = vst [vmem:[#allocation2 + $0x20] sm:$0xff] %v3189_v32 }
 0x5f2   :  { %v3191_v23 = vpop.eup %3190 }
 0x5f3   :  { %2359 = vst [vmem:[#allocation2 + $0x28] sm:$0xff] %v3191_v23 }
 0x5f4   :  { %v3193_v26 = vpop.eup %3192 }
 0x5f5   :  { %2360 = vst [vmem:[#allocation2 + $0x30] sm:$0xff] %v3193_v26 }
 0x5f6   :  { %v3195_v27 = vpop.eup %3194 }
 0x5f7   :  { %2361 = vst [vmem:[#allocation2 + $0x38] sm:$0xff] %v3195_v27  ;;  %2394 = vmatprep.subr.mxu0 %v3195_v27  ;;  %3131 = vmatprep.subr.mxu1 %v3195_v27 }
 0x5f8   :  { %2395 = vmatpush1.msra.mxu0 %v3193_v26  ;;  %3135 = vmatpush1.msra.mxu1 %v3193_v26 }
 0x5f9   :  { %2396 = vmatprep.subr.mxu0 %v3191_v23  ;;  %3132 = vmatprep.subr.mxu1 %v3191_v23 }
 0x5fa   :  { %2397 = vmatpush1.msra.mxu0 %v3189_v32  ;;  %3136 = vmatpush1.msra.mxu1 %v3189_v32 }
 0x5fb   :  { %2398 = vmatprep.subr.mxu0 %v3187_v31  ;;  %3133 = vmatprep.subr.mxu1 %v3187_v31 }
 0x5fc   :  { %2399 = vmatpush1.msra.mxu0 %v3185_v20  ;;  %3137 = vmatpush1.msra.mxu1 %v3185_v20 }
 0x5fd   :  { %2400 = vmatprep.subr.mxu0 %v3183_v29  ;;  %3134 = vmatprep.subr.mxu1 %v3183_v29  ;;  %v2536_v29 = vand.u32 2147483647, %v4429_v30 }
 0x5fe   :  { %2401 = vmatpush1.msra.mxu0 %v3181_v17  ;;  %3138 = vmatpush1.msra.mxu1 %v3181_v17  ;;  %v2514_v17 = vsub.f32 1.0, %v2470_v15 }
 0x5ff   :  { %2815 = vmatmul.mubr.msk.f32.vlgmr.msra.gmra.mxu0 %vm160_vm1, %v2362_v28  ;;  %2816 = vmatmul.mubr.msk.f32.vlgmr.msra.gmra.mxu1 %vm160_vm1, %v2363_v39  ;;  %v2541_v28 = vrot.slane %v2536_v29, %v4159_v35 }
 0x6bf   :  { %v2436_v42 = vpop.f32.mrf.mxu0  ;;  %v2442_v43 = vpop.f32.mrf.mxu1 }
 0x6c0   :  { %v2459_v33 = vmul.f32 %v2452_v40, %v2436_v42  ;;  %v2461_v45 = vmul.f32 %v2452_v40, %v2442_v43  ;;  %v2545_v42 = vrot.slane %v2536_v29, %v4164_v5 }
 0x6c1   :  { %v2438_v9 = vpop.f32.mrf.mxu0  ;;  %v2444_v10 = vpop.f32.mrf.mxu1 }
 0x6c2   :  { %v2460_v44 = vmul.f32 %v2456_v41, %v2438_v9  ;;  %v2462_v46 = vmul.f32 %v2456_v41, %v2444_v10  ;;  %v2550_v30 = vsel %vm2548_vm5, %v2545_v42, 0.0 }
 0x6c4   :  { %v2463_v47 = vadd.f32 %v2460_v44, %v2459_v33  ;;  %v2466_v48 = vadd.f32 %v2462_v46, %v2461_v45  ;;  %v2549_v33 = vsel %vm2548_vm5, %v2541_v28, 0.0 }
 0x6c5   :  { %v2551_v45 = vadd.f32 %v2550_v30, %v2549_v33 }
 0x6c6   :  { %2464 = vadd.xlane.f32.xlu0 %v2463_v47 }
 0x6ca   :  { %2467 = vadd.xlane.f32.xlu0 %v2466_v48 }
 0x74f   :  { %v2465_v25 = vpop.xlane.xlu0 %2464 }
 0x750   :  { %v2471_v49 = vand.u32 2147483647, %v2465_v25  ;;  %v2503_v62 = vsub.f32 0.0, %v2465_v25  ;;  %v2497_v7 = vmin.f32 %v2465_v25, 0.0 }
 0x752   :  { %v2473_v50 = vsub.f32 0.0, %v2471_v49  ;;  %v2505_v2 = vmin.f32 %v2503_v62, 0.0 }
 0x753   :  { %v2468_v51 = vpop.xlane.xlu0 %2467 }
 0x754   :  { %v2475_v52 = vmul.f32 1.442695, %v2473_v50  ;;  %v2472_v34 = vand.u32 2147483647, %v2468_v51  ;;  %v2504_v4 = vsub.f32 0.0, %v2468_v51  ;;  %v2498_v22 = vmin.f32 %v2468_v51, 0.0 }
 0x756   :  { %3196 = vpow2.f32 %v2475_v52  ;;  %v2474_v53 = vsub.f32 0.0, %v2472_v34  ;;  %v2506_v14 = vmin.f32 %v2504_v4, 0.0 }
 0x758   :  { %v2477_v54 = vmul.f32 1.442695, %v2474_v53 }
 0x75a   :  { %3198 = vpow2.f32 %v2477_v54 }
 0x763   :  { %v3197_v55 = vpop.eup %3196 }
 0x764   :  { %v2479_v56 = vadd.f32 1.0, %v3197_v55  ;;  %v2482_v59 = vmul.f32 -0.5, %v3197_v55  ;;  %v2485_v36 = vand.u32 2147483647, %v3197_v55 }
 0x766   :  { %3200 = vlog2.f32 %v2479_v56  ;;  %v2483_v60 = vadd.f32 1.0, %v2482_v59  ;;  %vm2486_vm2 = vcmp.lt.f32.partialorder %v2485_v36, 0.0004427343 }
 0x767   :  { %v3199_v57 = vpop.eup %3198 }
 0x768   :  { %v2488_v58 = vadd.f32 1.0, %v3199_v57  ;;  %v2491_v61 = vmul.f32 -0.5, %v3199_v57  ;;  %v2484_v0 = vmul.f32 %v3197_v55, %v2483_v60  ;;  %v2494_v3 = vand.u32 2147483647, %v3199_v57 }
 0x76a   :  { %3202 = vlog2.f32 %v2488_v58  ;;  %v2492_v37 = vadd.f32 1.0, %v2491_v61  ;;  %vm2495_vm3 = vcmp.lt.f32.partialorder %v2494_v3, 0.0004427343 }
 0x76c   :  { %v2493_v21 = vmul.f32 %v3199_v57, %v2492_v37 }
 0x773   :  { %v3201_v38 = vpop.eup %3200 }
 0x774   :  { %v2481_v63 = vmul.f32 0.6931472, %v3201_v38 }
 0x776   :  { %v2487_v6 = vsel %vm2486_vm2, %v2484_v0, %v2481_v63 }
 0x777   :  { %v3203_v8 = vpop.eup %3202  ;;  %v2499_v11 = vsub.f32 %v2497_v7, %v2487_v6  ;;  %v2507_v12 = vsub.f32 %v2505_v2, %v2487_v6 }
 0x778   :  { %v2490_v18 = vmul.f32 0.6931472, %v3203_v8 }
 0x779   :  { %v2501_v13 = vmax.f32 %v2499_v11, -100.0  ;;  %v2509_v24 = vmax.f32 %v2507_v12, -100.0 }
 0x77a   :  { %v2496_v19 = vsel %vm2495_vm3, %v2493_v21, %v2490_v18 }
 0x77b   :  { %v2500_v20 = vsub.f32 %v2498_v22, %v2496_v19  ;;  %v2508_v31 = vsub.f32 %v2506_v14, %v2496_v19  ;;  %v2511_v32 = vmul.f32 %v2501_v13, %v2469_v1  ;;  %v2515_v23 = vmul.f32 %v2513_v16, %v2509_v24 }
 0x77d   :  { %v2502_v26 = vmax.f32 %v2500_v20, -100.0  ;;  %v2510_v27 = vmax.f32 %v2508_v31, -100.0  ;;  %v2517_v41 = vadd.f32 %v2515_v23, %v2511_v32 }
 0x77f   :  { %v2512_v39 = vmul.f32 %v2502_v26, %v2470_v15  ;;  %v2516_v40 = vmul.f32 %v2514_v17, %v2510_v27  ;;  %v2520_v9 = vsel %vm2519_vm4, %v2517_v41, 0.0 }
 0x781   :  { %v2518_v43 = vadd.f32 %v2516_v40, %v2512_v39 }
 0x783   :  { %v2521_v10 = vsel %vm2519_vm4, %v2518_v43, 0.0 }
 0x784   :  { %v2522_v44 = vadd.f32 %v2521_v10, %v2520_v9 }
 0x786   :  { %2523 = vadd.xlane.f32.xlu1 %v2522_v44 }
 0x78a   :  { %2552 = vadd.xlane.f32.xlu1 %v2551_v45 }
 0x78b   :  { %3215 = shalt.err (!%p3212_p4)
}
 0x78c   :  { %s3250_s27 = smov 256   ;;  %s3251_s2 = smov 16   ;;  %vm2568_vm6 = vcmask 0  }
 0x78d   :  { %2581 = dma.vmem_to_hbm [thread:$0]  %s2576_s25, 1024, %s4462_s12, [#allocation3], %s3250_s27, %s3250_s27, %s3251_s2  }
 0x78e   :  { %s3252_s0 = smov [#allocation4]  }
 0x78f   :  { %s2588_s16 = sshll.u32 %s3252_s0, 4  ;;  %s2589_s16 = int_to_ptr.vmem [resolvable:$true] %s2588_s16 }
 0x790   :  { %s3224_s19 = scalar_lea.vmem %s2589_s16, 16  ;;  %s3228_s20 = scalar_lea.vmem %s2589_s16, 32 }
 0x791   :  { %p3225_p5 = scmp.ne.s32.totalorder %s2589_s16, %s3224_s19  ;;  %p3229_p6 = scmp.lt.s32.totalorder %s2589_s16, %s2589_s16 }
 0x792   :  { %p3230_p7 = scmp.lt.s32.totalorder %s3228_s20, %s3224_s19 }
 0x794   :  { %p3231_p8 = por %p3230_p7, %p3229_p6 }
 0x796   :  { %p3232_p9 = pnand %p3231_p8, %p3225_p5 }
 0x80f   :  { %v2524_v35 = vpop.xlane.xlu1 %2523 }
 0x810   :  { %v2525_v5 = vrot.slane %v2524_v35, 4 }
 0x812   :  { %v2526_v46 = vadd.f32 %v2525_v5, %v2524_v35 }
 0x813   :  { %v2553_v47 = vpop.xlane.xlu1 %2552 }
 0x814   :  { %v2527_v48 = vrot.slane %v2526_v46, 2  ;;  %v2554_v25 = vrot.slane %v2553_v47, 4 }
 0x816   :  { %v2555_v49 = vadd.f32 %v2554_v25, %v2553_v47  ;;  %v2528_v50 = vadd.f32 %v2527_v48, %v2526_v46 }
 0x818   :  { %v2556_v51 = vrot.slane %v2555_v49, 2  ;;  %v2529_v52 = vrot.slane %v2528_v50, 1 }
 0x81a   :  { %v2557_v34 = vadd.f32 %v2556_v51, %v2555_v49  ;;  %v2530_v53 = vadd.f32 %v2529_v52, %v2528_v50 }
 0x81c   :  { %3139 = vpush %v2530_v53  ;;  %v2558_v54 = vrot.slane %v2557_v34, 1 }
 0x81e   :  { %v2559_v55 = vadd.f32 %v2558_v54, %v2557_v34 }
 0x820   :  { %3141 = vpush %v2559_v55 }
 0x84d   :  { %s3140_s30 = spop %3139 }
 0x84e   :  { %s2534_s14 = smul.f32 0.0625, %s3140_s30 }
 0x850   :  { %s2535_s17 = ssub.f32 0.0, %s2534_s14 }
 0x851   :  { %s3142_s15 = spop %3141 }
 0x852   :  { %s2563_s12 = smul.f32 0.00390625, %s3142_s15 }
 0x854   :  { %s2565_s3 = smul.f32 0.01, %s2563_s12 }
 0x856   :  { %s2566_s18 = sadd.f32 %s2565_s3, %s2535_s17 }
 0x858   :  { %v2567_v56 = vstv %s2566_s18 }
 0x859   :  { %2569 = vst.msk [vmem:[#allocation4] sm:$0x1] %vm2568_vm6, %v2567_v56 }
 0x85a   :  { %3235 = shalt.err (!%p3232_p9)
}
 0x85b   :  { %2591 = dma.vmem_to_hbm [thread:$0]  %s2589_s16, 16, %s4463_s13, [#allocation5]  }
 0x85c   :  { %3244 = dma.done.wait [#allocation3], 1024  }
 0x85d   :  { %3245 = vsyncadd [#allocation3], 4294966272 }
 0x85e   :  { %3246 = dma.done.wait [#allocation5], 16  }
 0x85f   :  { %3247 = vsyncadd [#allocation5], 4294967280 }
 0x860   :  { %2598 = vsyncpa [#allocation3], 1 }
 0x861   :  { %2599 = vsyncpa [#allocation5], 1 }

</bundles_post_ra>
